<compile_context>
chip_gen: v6e
topology: v6e:2x2x1
jax: 0.10.0
libtpu: 0.0.40
codegen_flags: <defaults>
</compile_context>

<pallas_src>
import jax
import jax.numpy as jnp
from jax.experimental import pallas as pl
from jax.experimental.pallas import tpu as pltpu


LANE = 128          # pad hidden size to a lane multiple (aligned gate slabs)
BATCH_ALIGN = 16    # pad batch to bf16 sublane packing (tile-aligned reshapes)
CHUNK_TARGET = 128  # target timesteps per pipelined chunk


def _round_up(x, m):
    return (x + m - 1) // m * m


def _pick_chunk(T, target=CHUNK_TARGET):
    """Largest divisor of T that is <= target, so T % Tc == 0 and the backward
    direction never sees padded timesteps."""
    # TODO(synk): for large prime T this degenerates to Tc == 1; a masked
    # ragged-T variant would be needed for such shapes.
    best = 1
    for c in range(1, min(T, target) + 1):
        if T % c == 0:
            best = c
    return best


# ---------------------------------------------------------------------------
# Pallas kernel: one (direction, time-chunk) grid step of one LSTM layer
# ---------------------------------------------------------------------------
def _lstm_layer_kernel(x_ref, wih_ref, whh_ref, bias_ref, out_ref,
                       xw_ref, h_ref, c_ref):
    """
    x_ref   : (Tc, Bp, Din) bf16  input chunk (pipelined / double-buffered)
    wih_ref : (Din, 4Hp)    bf16  input-projection weights (resident)
    whh_ref : (Hp, 4Hp)     bf16  recurrent weights (resident)
    bias_ref: (1, 4Hp)      f32   b_ih + b_hh
    out_ref : (Tc, Bp, Hp)        this direction's lane slab of (T,Bp,ND*Hp)
    xw_ref  : (Tc, Bp, 4Hp) f32   scratch: pre-projected gates for the chunk
    h_ref   : (Bp, Hp)      f32   scratch: h carried across time chunks
    c_ref   : (Bp, Hp)      f32   scratch: c carried across time chunks
    """
    d = pl.program_id(0)       # direction: 0 = forward, 1 = backward
    tc = pl.program_id(1)      # time-chunk index (chunks reversed for bwd)
    Tc, Bp, Din = x_ref.shape
    Hp = whh_ref.shape[0]

    # (Re)initialize carried state at the first chunk of each direction.
    @pl.when(tc == 0)
    def _():
        h_ref[...] = jnp.zeros_like(h_ref)
        c_ref[...] = jnp.zeros_like(c_ref)

    # Fused input projection for the whole chunk: one large MXU matmul off the
    # serial critical path (bf16 operands, f32 accumulation), bias folded in.
    x2d = x_ref[...].reshape(Tc * Bp, Din)
    xw = jnp.dot(x2d, wih_ref[...], preferred_element_type=jnp.float32)
    xw_ref[...] = xw.reshape(Tc, Bp, 4 * Hp) + bias_ref[...]

    whh = whh_ref[...]                            # (Hp, 4Hp) bf16, resident
    # TODO(synk): on v5e, weight-stationary MXU driving (pltpu.matmul_push_rhs
    # once per chunk + matmul_acc_lhs/matmul_pop per step) would avoid
    # re-staging W_hh every timestep for very small batch.

    # Backward direction walks the chunk in reverse (chunk order is reversed
    # by the index_maps; in-chunk order here).
    t0 = d * (Tc - 1)
    dt = 1 - 2 * d

    def step(s, carry):
        h, c = carry                              # f32 (Bp, Hp)
        t = t0 + dt * s
        # Single small MXU matmul on the serial critical path.
        gates = xw_ref[t] + jnp.dot(h.astype(whh.dtype), whh,
                                    preferred_element_type=jnp.float32)
        # Lane-aligned slab activations; gate order is [i, f, g, o].
        sif = jax.nn.sigmoid(gates[:, :2 * Hp])
        i = sif[:, :Hp]
        f = sif[:, Hp:]
        g = jnp.tanh(gates[:, 2 * Hp:3 * Hp])
        o = jax.nn.sigmoid(gates[:, 3 * Hp:])
        c_new = f * c + i * g
        h_new = o * jnp.tanh(c_new)
        out_ref[t] = h_new.astype(out_ref.dtype)
        return h_new, c_new

    # Small fixed unroll: lets the scheduler overlap step t's store and step
    # t+1's gate load / weight push with step t's VPU/EUP work.
    unroll = 8 if Tc % 8 == 0 else (4 if Tc % 4 == 0 else 1)
    h_fin, c_fin = jax.lax.fori_loop(0, Tc, step, (h_ref[...], c_ref[...]),
                                     unroll=unroll)
    h_ref[...] = h_fin
    c_ref[...] = c_fin


def lstm_layer(x_tbd, wih, whh, bias, *, out_dtype=jnp.bfloat16):
    """One LSTM layer (all directions) as a single pallas_call.

    x_tbd: (T, Bp, Din) bf16   time-major input
    wih  : (ND, Din, 4Hp) bf16
    whh  : (ND, Hp, 4Hp)  bf16
    bias : (ND, 1, 4Hp)   f32
    returns (T, Bp, ND*Hp) out_dtype — directions concatenated on lanes.
    """
    T, Bp, Din = x_tbd.shape
    ND, _, G = wih.shape
    Hp = G // 4
    Tc = _pick_chunk(T)
    NC = T // Tc

    # Chunk index: forward walks 0..NC-1, backward walks NC-1..0.
    def time_block(d, tc):
        return d * (NC - 1) + (1 - 2 * d) * tc

    out_bytes = jnp.dtype(out_dtype).itemsize
    vmem_bytes = (
        2 * Tc * Bp * Din * 2            # x chunk (bf16, double-buffered)
        + 2 * Din * G * 2                # W_ih (bf16)
        + 2 * Hp * G * 2                 # W_hh (bf16)
        + 2 * G * 4                      # bias (f32)
        + 2 * Tc * Bp * Hp * out_bytes   # out chunk
        + Tc * Bp * G * 4                # xw scratch (f32)
        + 2 * Bp * Hp * 4                # h, c scratch
    )
    vmem_limit = min(int(vmem_bytes * 2) + (8 << 20), 64 << 20)

    cost = pl.CostEstimate(
        flops=int(2 * ND * T * Bp * (Din + Hp) * G),
        transcendentals=int(ND * T * Bp * 5 * Hp),
        bytes_accessed=int(ND * T * Bp * Din * 2
                           + T * Bp * ND * Hp * out_bytes
                           + ND * (Din + Hp) * G * 2 + ND * G * 4),
    )

    # TODO(synk): when ND == 1, a second "parallel" grid axis splitting the
    # batch would keep both v7x TensorCores busy; omitted here.
    return pl.pallas_call(
        _lstm_layer_kernel,
        out_shape=jax.ShapeDtypeStruct((T, Bp, ND * Hp), out_dtype),
        grid_spec=pltpu.PrefetchScalarGridSpec(
            num_scalar_prefetch=0,
            grid=(ND, NC),
            in_specs=[
                pl.BlockSpec((Tc, Bp, Din), lambda d, tc: (time_block(d, tc), 0, 0)),
                pl.BlockSpec((None, Din, G), lambda d, tc: (d, 0, 0)),
                pl.BlockSpec((None, Hp, G), lambda d, tc: (d, 0, 0)),
                pl.BlockSpec((None, 1, G), lambda d, tc: (d, 0, 0)),
            ],
            # Each direction writes its own lane slab of the concatenated
            # (T, Bp, ND*Hp) output -> no wrapper-side transpose/concat.
            out_specs=pl.BlockSpec((Tc, Bp, Hp),
                                   lambda d, tc: (time_block(d, tc), 0, d)),
            scratch_shapes=[
                pltpu.VMEM((Tc, Bp, G), jnp.float32),   # per-chunk gates
                pltpu.VMEM((Bp, Hp), jnp.float32),      # h carried across chunks
                pltpu.VMEM((Bp, Hp), jnp.float32),      # c carried across chunks
            ],
        ),
        compiler_params=pltpu.CompilerParams(
            dimension_semantics=("parallel", "arbitrary"),
            vmem_limit_bytes=vmem_limit),
        cost_estimate=cost,
    )(x_tbd, wih, whh, bias)


# ---------------------------------------------------------------------------
# Weight padding helpers (padded rows/lanes are zero -> padded hidden lanes
# stay exactly zero through the recurrence)
# ---------------------------------------------------------------------------
def _pad_gate_cols(w, H, Hp):
    """(..., 4H) -> (..., 4Hp): zero-pad each of the [i,f,g,o] slabs to Hp."""
    if Hp == H:
        return w
    pads = [(0, 0)] * (w.ndim - 1)
    parts = [jnp.pad(w[..., k * H:(k + 1) * H], pads + [(0, Hp - H)])
             for k in range(4)]
    return jnp.concatenate(parts, axis=-1)


def _pad_dir_rows(w, nd, H, Hp):
    """(nd*H, ...) -> (nd*Hp, ...): zero-pad each per-direction row block."""
    if Hp == H:
        return w
    pads = [(0, 0)] * (w.ndim - 1)
    parts = [jnp.pad(w[k * H:(k + 1) * H], [(0, Hp - H)] + pads)
             for k in range(nd)]
    return jnp.concatenate(parts, axis=0)


# ---------------------------------------------------------------------------
# Module wrapper
# ---------------------------------------------------------------------------
class FullRNNPallas:
    """Pallas port of Full_RNN.forward (LSTM, batch_first, zero init state)."""

    def __init__(self, in_dim, num_hidden, num_layer, bidirect, dropout,
                 rnn_type="LSTM", *, key=None):
        if rnn_type != "LSTM":
            # TODO(synk): GRU branch of Full_RNN not implemented; the module is
            # instantiated with the default rnn_type='LSTM'.
            raise NotImplementedError("only LSTM is implemented")
        # TODO(synk): inter-layer dropout is a train-mode op in nn.LSTM; this
        # port uses inference semantics (dropout is a no-op).
        self.in_dim = in_dim
        self.num_hidden = num_hidden
        self.num_layer = num_layer
        self.num_bidirect = 1 + int(bidirect)
        self.dropout = dropout
        self.Hp = _round_up(num_hidden, LANE)

        if key is None:
            key = jax.random.PRNGKey(0)

        H, Hp, ND = num_hidden, self.Hp, self.num_bidirect
        bound = 1.0 / (num_hidden ** 0.5)   # PyTorch nn.LSTM init

        self.params = []      # padded, kernel-side
        self.ref_params = []  # unpadded, for the pure-JAX reference
        for layer in range(num_layer):
            d_true = in_dim if layer == 0 else H * ND
            wih_p, whh_p, bias_p = [], [], []
            wih_t, whh_t, bias_t = [], [], []
            for _ in range(ND):
                key, k1, k2, k3, k4 = jax.random.split(key, 5)
                w_ih = jax.random.uniform(k1, (4 * H, d_true), jnp.float32, -bound, bound)
                w_hh = jax.random.uniform(k2, (4 * H, H), jnp.float32, -bound, bound)
                b_ih = jax.random.uniform(k3, (4 * H,), jnp.float32, -bound, bound)
                b_hh = jax.random.uniform(k4, (4 * H,), jnp.float32, -bound, bound)
                wih_T = w_ih.T            # (d_true, 4H)
                whh_T = w_hh.T            # (H, 4H)
                b = b_ih + b_hh           # (4H,)

                wih_t.append(wih_T.astype(jnp.bfloat16))
                whh_t.append(whh_T.astype(jnp.bfloat16))
                bias_t.append(b)

                wp = wih_T if layer == 0 else _pad_dir_rows(wih_T, ND, H, Hp)
                wih_p.append(_pad_gate_cols(wp, H, Hp).astype(jnp.bfloat16))
                whh_p.append(_pad_gate_cols(_pad_dir_rows(whh_T, 1, H, Hp),
                                            H, Hp).astype(jnp.bfloat16))
                bias_p.append(_pad_gate_cols(b[None, :], H, Hp))
            self.params.append((jnp.stack(wih_p), jnp.stack(whh_p), jnp.stack(bias_p)))
            self.ref_params.append((jnp.stack(wih_t), jnp.stack(whh_t), jnp.stack(bias_t)))

    def __call__(self, x):
        """x: (B, T, in_dim) -> output: (B, T, num_hidden * num_bidirect)."""
        B, T, _ = x.shape
        Bp = _round_up(B, BATCH_ALIGN)
        H, Hp, ND = self.num_hidden, self.Hp, self.num_bidirect

        h = jnp.transpose(x, (1, 0, 2))                 # (T, B, D) time-major
        if Bp != B:
            h = jnp.pad(h, ((0, 0), (0, Bp - B), (0, 0)))
        h = h.astype(jnp.bfloat16)

        for layer in range(self.num_layer):
            wih, whh, bias = self.params[layer]
            last = layer == self.num_layer - 1
            # inter-layer activations stay bf16; the final layer emits f32
            h = lstm_layer(h, wih, whh, bias,
                           out_dtype=jnp.float32 if last else jnp.bfloat16)
            # h: (T, Bp, ND*Hp), directions already concatenated on lanes

        if Hp != H:
            h = jnp.concatenate([h[..., d * Hp:d * Hp + H] for d in range(ND)],
                                axis=-1)
        h = h[:, :B]
        return jnp.transpose(h, (1, 0, 2))              # (B, T, H * num_dirs)


# ---------------------------------------------------------------------------
# Pure-JAX reference (same precision choices) for correctness checking
# ---------------------------------------------------------------------------
def lstm_reference_forward(x_btd, params):
    x = jnp.transpose(x_btd, (1, 0, 2))                 # (T, B, D)
    T, B, _ = x.shape
    layer_in = x
    for wih, whh, bias in params:
        ND = wih.shape[0]
        H = whh.shape[1]
        outs = []
        for d in range(ND):
            xs = layer_in if d == 0 else layer_in[::-1]

            def step(carry, x_t, d=d):
                h, c = carry
                gates = (jnp.dot(x_t.astype(jnp.bfloat16), wih[d],
                                 preferred_element_type=jnp.float32)
                         + bias[d]
                         + jnp.dot(h.astype(jnp.bfloat16), whh[d],
                                   preferred_element_type=jnp.float32))
                i = jax.nn.sigmoid(gates[:, 0 * H:1 * H])
                f = jax.nn.sigmoid(gates[:, 1 * H:2 * H])
                g = jnp.tanh(gates[:, 2 * H:3 * H])
                o = jax.nn.sigmoid(gates[:, 3 * H:4 * H])
                c = f * c + i * g
                h = o * jnp.tanh(c)
                return (h, c), h

            h0 = jnp.zeros((B, H), jnp.float32)
            c0 = jnp.zeros((B, H), jnp.float32)
            _, hs = jax.lax.scan(step, (h0, c0), xs)
            if d == 1:
                hs = hs[::-1]
            outs.append(hs)
        layer_in = outs[0] if ND == 1 else jnp.concatenate(outs, axis=-1)
    return jnp.transpose(layer_in, (1, 0, 2))


if __name__ == "__main__":
    # small shapes consistent with the module's forward (batch_first sequence)
    B, T = 2, 8
    in_dim, num_hidden, num_layer = 16, 32, 2
    bidirect = True

    key = jax.random.PRNGKey(0)
    k_param, k_x = jax.random.split(key)

    model = FullRNNPallas(in_dim, num_hidden, num_layer, bidirect,
                          dropout=0.0, rnn_type="LSTM", key=k_param)

    x = jax.random.normal(k_x, (B, T, in_dim), dtype=jnp.float32)

    out = jax.block_until_ready(model(x))
    ref = jax.block_until_ready(lstm_reference_forward(x, model.ref_params))

    assert out.shape == (B, T, num_hidden * (1 + int(bidirect))), out.shape
    assert jnp.all(jnp.isfinite(out))
    err = float(jnp.max(jnp.abs(out - ref)))
    assert err < 2e-3, f"max abs error vs reference: {err}"
    print("KERNEL_OK")
</pallas_src>

<mosaic_0001>
module attributes {stable_mosaic.version = 11 : i64} {
  func.func @_lstm_layer_kernel(%arg0: i32, %arg1: i32, %arg2: memref<8x16x16xbf16, #tpu.memory_space<vmem>>, %arg3: memref<1x16x512xbf16, #tpu.memory_space<vmem>>, %arg4: memref<1x128x512xbf16, #tpu.memory_space<vmem>>, %arg5: memref<1x1x512xf32, #tpu.memory_space<vmem>>, %arg6: memref<8x16x128xbf16, #tpu.memory_space<vmem>>, %arg7: memref<8x16x512xf32, #tpu.memory_space<vmem>>, %arg8: memref<16x128xf32, #tpu.memory_space<vmem>>, %arg9: memref<16x128xf32, #tpu.memory_space<vmem>>) attributes {dimension_semantics = [#tpu.dimension_semantics<parallel>, #tpu.dimension_semantics<arbitrary>], iteration_bounds = array<i64: 2, 1>, scalar_prefetch = 0 : i64, scratch_operands = 3 : i64, tpu.core_type = #tpu.core_type<tc>, window_params = [{transform_indices = @transform_0, window_bounds = array<i64: 8, 16, 16>}, {transform_indices = @transform_1, window_bounds = array<i64: 1, 16, 512>}, {transform_indices = @transform_2, window_bounds = array<i64: 1, 128, 512>}, {transform_indices = @transform_3, window_bounds = array<i64: 1, 1, 512>}, {transform_indices = @transform_4, window_bounds = array<i64: 8, 16, 128>}]} {
    %c0_i32 = arith.constant 0 : i32
    %0 = arith.cmpi eq, %arg1, %c0_i32 : i32
    %1 = arith.extui %0 : i1 to i32
    %c0_i32_0 = arith.constant 0 : i32
    %2 = arith.cmpi ne, %1, %c0_i32_0 : i32
    scf.if %2 {
      %cst_83 = arith.constant 0.000000e+00 : f32
      %296 = vector.broadcast %cst_83 : f32 to vector<16x128xf32>
      %c0_84 = arith.constant 0 : index
      %c0_85 = arith.constant 0 : index
      %297 = vector.load %arg8[%c0_84, %c0_85] : memref<16x128xf32, #tpu.memory_space<vmem>>, vector<16x128xf32>
      tpu.vector_store %arg8[%c0_84, %c0_85], %296 {strides = array<i32>} : memref<16x128xf32, #tpu.memory_space<vmem>>, vector<16x128xf32>,
      %cst_86 = arith.constant 0.000000e+00 : f32
      %298 = vector.broadcast %cst_86 : f32 to vector<16x128xf32>
      %c0_87 = arith.constant 0 : index
      %c0_88 = arith.constant 0 : index
      %299 = vector.load %arg9[%c0_87, %c0_88] : memref<16x128xf32, #tpu.memory_space<vmem>>, vector<16x128xf32>
      tpu.vector_store %arg9[%c0_87, %c0_88], %298 {strides = array<i32>} : memref<16x128xf32, #tpu.memory_space<vmem>>, vector<16x128xf32>,
    } else {
    }
    %c0 = arith.constant 0 : index
    %c0_1 = arith.constant 0 : index
    %c0_2 = arith.constant 0 : index
    %3 = vector.load %arg2[%c0, %c0_1, %c0_2] : memref<8x16x16xbf16, #tpu.memory_space<vmem>>, vector<8x16x16xbf16>
    %4 = vector.shape_cast %3 : vector<8x16x16xbf16> to vector<128x16xbf16>
    %c0_3 = arith.constant 0 : index
    %c0_4 = arith.constant 0 : index
    %c0_5 = arith.constant 0 : index
    %5 = vector.load %arg3[%c0_3, %c0_4, %c0_5] : memref<1x16x512xbf16, #tpu.memory_space<vmem>>, vector<1x16x512xbf16>
    %6 = vector.shape_cast %5 : vector<1x16x512xbf16> to vector<16x512xbf16>
    %cst = arith.constant dense<0.000000e+00> : vector<128x512xf32>
    %7 = tpu.matmul %4, %6, %cst {dimension_numbers = #tpu.dot_dimension_numbers<[1], [0], [0], [1], [0, 0, 1, 1], [], []>} : vector<128x16xbf16>, vector<16x512xbf16>, vector<128x512xf32> -> vector<128x512xf32>
    %8 = vector.shape_cast %7 : vector<128x512xf32> to vector<8x16x512xf32>
    %c0_6 = arith.constant 0 : index
    %c0_7 = arith.constant 0 : index
    %c0_8 = arith.constant 0 : index
    %9 = vector.load %arg5[%c0_6, %c0_7, %c0_8] : memref<1x1x512xf32, #tpu.memory_space<vmem>>, vector<1x1x512xf32>
    %10 = vector.shape_cast %9 : vector<1x1x512xf32> to vector<1x512xf32>
    %11 = vector.shape_cast %10 : vector<1x512xf32> to vector<1x1x512xf32>
    %12 = vector.broadcast %11 : vector<1x1x512xf32> to vector<8x16x512xf32>
    %13 = arith.addf %8, %12 : vector<8x16x512xf32>
    %c0_9 = arith.constant 0 : index
    %c0_10 = arith.constant 0 : index
    %c0_11 = arith.constant 0 : index
    %14 = vector.load %arg7[%c0_9, %c0_10, %c0_11] : memref<8x16x512xf32, #tpu.memory_space<vmem>>, vector<8x16x512xf32>
    tpu.vector_store %arg7[%c0_9, %c0_10, %c0_11], %13 {strides = array<i32>} : memref<8x16x512xf32, #tpu.memory_space<vmem>>, vector<8x16x512xf32>,
    %c0_12 = arith.constant 0 : index
    %c0_13 = arith.constant 0 : index
    %c0_14 = arith.constant 0 : index
    %15 = vector.load %arg4[%c0_12, %c0_13, %c0_14] : memref<1x128x512xbf16, #tpu.memory_space<vmem>>, vector<1x128x512xbf16>
    %16 = vector.shape_cast %15 : vector<1x128x512xbf16> to vector<128x512xbf16>
    %c7_i32 = arith.constant 7 : i32
    %17 = arith.muli %arg0, %c7_i32 : i32
    %c2_i32 = arith.constant 2 : i32
    %18 = arith.muli %c2_i32, %arg0 : i32
    %c1_i32 = arith.constant 1 : i32
    %19 = arith.subi %c1_i32, %18 : i32
    %c0_15 = arith.constant 0 : index
    %c0_16 = arith.constant 0 : index
    %20 = vector.load %arg8[%c0_15, %c0_16] : memref<16x128xf32, #tpu.memory_space<vmem>>, vector<16x128xf32>
    %c0_17 = arith.constant 0 : index
    %c0_18 = arith.constant 0 : index
    %21 = vector.load %arg9[%c0_17, %c0_18] : memref<16x128xf32, #tpu.memory_space<vmem>>, vector<16x128xf32>
    %c0_i32_19 = arith.constant 0 : i32
    %22 = arith.muli %19, %c0_i32_19 : i32
    %23 = arith.addi %17, %22 : i32
    %24 = arith.index_cast %23 : i32 to index
    %c0_20 = arith.constant 0 : index
    %c0_21 = arith.constant 0 : index
    %25 = vector.load %arg7[%24, %c0_20, %c0_21] : memref<8x16x512xf32, #tpu.memory_space<vmem>>, vector<1x16x512xf32>
    %26 = vector.shape_cast %25 : vector<1x16x512xf32> to vector<16x512xf32>
    %27 = arith.truncf %20 : vector<16x128xf32> to vector<16x128xbf16>
    %cst_22 = arith.constant dense<0.000000e+00> : vector<16x512xf32>
    %28 = tpu.matmul %27, %16, %cst_22 {dimension_numbers = #tpu.dot_dimension_numbers<[1], [0], [0], [1], [0, 0, 1, 1], [], []>} : vector<16x128xbf16>, vector<128x512xbf16>, vector<16x512xf32> -> vector<16x512xf32>
    %29 = arith.addf %26, %28 : vector<16x512xf32>
    %30 = vector.extract_strided_slice %29 {offsets = [0, 0], sizes = [16, 256], strides = [1, 1]} : vector<16x512xf32> to vector<16x256xf32>
    %31 = arith.negf %30 : vector<16x256xf32>
    %32 = math.exp %31 : vector<16x256xf32>
    %cst_23 = arith.constant 1.000000e+00 : f32
    %33 = vector.broadcast %cst_23 : f32 to vector<16x256xf32>
    %34 = arith.addf %33, %32 : vector<16x256xf32>
    %35 = arith.divf %33, %34 : vector<16x256xf32>
    %36 = vector.extract_strided_slice %35 {offsets = [0, 0], sizes = [16, 128], strides = [1, 1]} : vector<16x256xf32> to vector<16x128xf32>
    %37 = vector.extract_strided_slice %35 {offsets = [0, 128], sizes = [16, 128], strides = [1, 1]} : vector<16x256xf32> to vector<16x128xf32>
    %38 = vector.extract_strided_slice %29 {offsets = [0, 256], sizes = [16, 128], strides = [1, 1]} : vector<16x512xf32> to vector<16x128xf32>
    %39 = math.tanh %38 : vector<16x128xf32>
    %40 = vector.extract_strided_slice %29 {offsets = [0, 384], sizes = [16, 128], strides = [1, 1]} : vector<16x512xf32> to vector<16x128xf32>
    %41 = arith.negf %40 : vector<16x128xf32>
    %42 = math.exp %41 : vector<16x128xf32>
    %cst_24 = arith.constant 1.000000e+00 : f32
    %43 = vector.broadcast %cst_24 : f32 to vector<16x128xf32>
    %44 = arith.addf %43, %42 : vector<16x128xf32>
    %45 = arith.divf %43, %44 : vector<16x128xf32>
    %46 = arith.mulf %37, %21 : vector<16x128xf32>
    %47 = arith.mulf %36, %39 : vector<16x128xf32>
    %48 = arith.addf %46, %47 : vector<16x128xf32>
    %49 = math.tanh %48 : vector<16x128xf32>
    %50 = arith.mulf %45, %49 : vector<16x128xf32>
    %51 = arith.truncf %50 : vector<16x128xf32> to vector<16x128xbf16>
    %52 = arith.index_cast %23 : i32 to index
    %c0_25 = arith.constant 0 : index
    %c0_26 = arith.constant 0 : index
    %53 = vector.load %arg6[%52, %c0_25, %c0_26] : memref<8x16x128xbf16, #tpu.memory_space<vmem>>, vector<1x16x128xbf16>
    %54 = vector.shape_cast %53 : vector<1x16x128xbf16> to vector<16x128xbf16>
    %55 = vector.shape_cast %51 : vector<16x128xbf16> to vector<1x16x128xbf16>
    tpu.vector_store %arg6[%52, %c0_25, %c0_26], %55 {strides = array<i32>} : memref<8x16x128xbf16, #tpu.memory_space<vmem>>, vector<1x16x128xbf16>,
    %c1_i32_27 = arith.constant 1 : i32
    %56 = arith.muli %19, %c1_i32_27 : i32
    %57 = arith.addi %17, %56 : i32
    %58 = arith.index_cast %57 : i32 to index
    %c0_28 = arith.constant 0 : index
    %c0_29 = arith.constant 0 : index
    %59 = vector.load %arg7[%58, %c0_28, %c0_29] : memref<8x16x512xf32, #tpu.memory_space<vmem>>, vector<1x16x512xf32>
    %60 = vector.shape_cast %59 : vector<1x16x512xf32> to vector<16x512xf32>
    %61 = arith.truncf %50 : vector<16x128xf32> to vector<16x128xbf16>
    %cst_30 = arith.constant dense<0.000000e+00> : vector<16x512xf32>
    %62 = tpu.matmul %61, %16, %cst_30 {dimension_numbers = #tpu.dot_dimension_numbers<[1], [0], [0], [1], [0, 0, 1, 1], [], []>} : vector<16x128xbf16>, vector<128x512xbf16>, vector<16x512xf32> -> vector<16x512xf32>
    %63 = arith.addf %60, %62 : vector<16x512xf32>
    %64 = vector.extract_strided_slice %63 {offsets = [0, 0], sizes = [16, 256], strides = [1, 1]} : vector<16x512xf32> to vector<16x256xf32>
    %65 = arith.negf %64 : vector<16x256xf32>
    %66 = math.exp %65 : vector<16x256xf32>
    %cst_31 = arith.constant 1.000000e+00 : f32
    %67 = vector.broadcast %cst_31 : f32 to vector<16x256xf32>
    %68 = arith.addf %67, %66 : vector<16x256xf32>
    %69 = arith.divf %67, %68 : vector<16x256xf32>
    %70 = vector.extract_strided_slice %69 {offsets = [0, 0], sizes = [16, 128], strides = [1, 1]} : vector<16x256xf32> to vector<16x128xf32>
    %71 = vector.extract_strided_slice %69 {offsets = [0, 128], sizes = [16, 128], strides = [1, 1]} : vector<16x256xf32> to vector<16x128xf32>
    %72 = vector.extract_strided_slice %63 {offsets = [0, 256], sizes = [16, 128], strides = [1, 1]} : vector<16x512xf32> to vector<16x128xf32>
    %73 = math.tanh %72 : vector<16x128xf32>
    %74 = vector.extract_strided_slice %63 {offsets = [0, 384], sizes = [16, 128], strides = [1, 1]} : vector<16x512xf32> to vector<16x128xf32>
    %75 = arith.negf %74 : vector<16x128xf32>
    %76 = math.exp %75 : vector<16x128xf32>
    %cst_32 = arith.constant 1.000000e+00 : f32
    %77 = vector.broadcast %cst_32 : f32 to vector<16x128xf32>
    %78 = arith.addf %77, %76 : vector<16x128xf32>
    %79 = arith.divf %77, %78 : vector<16x128xf32>
    %80 = arith.mulf %71, %48 : vector<16x128xf32>
    %81 = arith.mulf %70, %73 : vector<16x128xf32>
    %82 = arith.addf %80, %81 : vector<16x128xf32>
    %83 = math.tanh %82 : vector<16x128xf32>
    %84 = arith.mulf %79, %83 : vector<16x128xf32>
    %85 = arith.truncf %84 : vector<16x128xf32> to vector<16x128xbf16>
    %86 = arith.index_cast %57 : i32 to index
    %c0_33 = arith.constant 0 : index
    %c0_34 = arith.constant 0 : index
    %87 = vector.load %arg6[%86, %c0_33, %c0_34] : memref<8x16x128xbf16, #tpu.memory_space<vmem>>, vector<1x16x128xbf16>
    %88 = vector.shape_cast %87 : vector<1x16x128xbf16> to vector<16x128xbf16>
    %89 = vector.shape_cast %85 : vector<16x128xbf16> to vector<1x16x128xbf16>
    tpu.vector_store %arg6[%86, %c0_33, %c0_34], %89 {strides = array<i32>} : memref<8x16x128xbf16, #tpu.memory_space<vmem>>, vector<1x16x128xbf16>,
    %c2_i32_35 = arith.constant 2 : i32
    %90 = arith.muli %19, %c2_i32_35 : i32
    %91 = arith.addi %17, %90 : i32
    %92 = arith.index_cast %91 : i32 to index
    %c0_36 = arith.constant 0 : index
    %c0_37 = arith.constant 0 : index
    %93 = vector.load %arg7[%92, %c0_36, %c0_37] : memref<8x16x512xf32, #tpu.memory_space<vmem>>, vector<1x16x512xf32>
    %94 = vector.shape_cast %93 : vector<1x16x512xf32> to vector<16x512xf32>
    %95 = arith.truncf %84 : vector<16x128xf32> to vector<16x128xbf16>
    %cst_38 = arith.constant dense<0.000000e+00> : vector<16x512xf32>
    %96 = tpu.matmul %95, %16, %cst_38 {dimension_numbers = #tpu.dot_dimension_numbers<[1], [0], [0], [1], [0, 0, 1, 1], [], []>} : vector<16x128xbf16>, vector<128x512xbf16>, vector<16x512xf32> -> vector<16x512xf32>
    %97 = arith.addf %94, %96 : vector<16x512xf32>
    %98 = vector.extract_strided_slice %97 {offsets = [0, 0], sizes = [16, 256], strides = [1, 1]} : vector<16x512xf32> to vector<16x256xf32>
    %99 = arith.negf %98 : vector<16x256xf32>
    %100 = math.exp %99 : vector<16x256xf32>
    %cst_39 = arith.constant 1.000000e+00 : f32
    %101 = vector.broadcast %cst_39 : f32 to vector<16x256xf32>
    %102 = arith.addf %101, %100 : vector<16x256xf32>
    %103 = arith.divf %101, %102 : vector<16x256xf32>
    %104 = vector.extract_strided_slice %103 {offsets = [0, 0], sizes = [16, 128], strides = [1, 1]} : vector<16x256xf32> to vector<16x128xf32>
    %105 = vector.extract_strided_slice %103 {offsets = [0, 128], sizes = [16, 128], strides = [1, 1]} : vector<16x256xf32> to vector<16x128xf32>
    %106 = vector.extract_strided_slice %97 {offsets = [0, 256], sizes = [16, 128], strides = [1, 1]} : vector<16x512xf32> to vector<16x128xf32>
    %107 = math.tanh %106 : vector<16x128xf32>
    %108 = vector.extract_strided_slice %97 {offsets = [0, 384], sizes = [16, 128], strides = [1, 1]} : vector<16x512xf32> to vector<16x128xf32>
    %109 = arith.negf %108 : vector<16x128xf32>
    %110 = math.exp %109 : vector<16x128xf32>
    %cst_40 = arith.constant 1.000000e+00 : f32
    %111 = vector.broadcast %cst_40 : f32 to vector<16x128xf32>
    %112 = arith.addf %111, %110 : vector<16x128xf32>
    %113 = arith.divf %111, %112 : vector<16x128xf32>
    %114 = arith.mulf %105, %82 : vector<16x128xf32>
    %115 = arith.mulf %104, %107 : vector<16x128xf32>
    %116 = arith.addf %114, %115 : vector<16x128xf32>
    %117 = math.tanh %116 : vector<16x128xf32>
    %118 = arith.mulf %113, %117 : vector<16x128xf32>
    %119 = arith.truncf %118 : vector<16x128xf32> to vector<16x128xbf16>
    %120 = arith.index_cast %91 : i32 to index
    %c0_41 = arith.constant 0 : index
    %c0_42 = arith.constant 0 : index
    %121 = vector.load %arg6[%120, %c0_41, %c0_42] : memref<8x16x128xbf16, #tpu.memory_space<vmem>>, vector<1x16x128xbf16>
    %122 = vector.shape_cast %121 : vector<1x16x128xbf16> to vector<16x128xbf16>
    %123 = vector.shape_cast %119 : vector<16x128xbf16> to vector<1x16x128xbf16>
    tpu.vector_store %arg6[%120, %c0_41, %c0_42], %123 {strides = array<i32>} : memref<8x16x128xbf16, #tpu.memory_space<vmem>>, vector<1x16x128xbf16>,
    %c3_i32 = arith.constant 3 : i32
    %124 = arith.muli %19, %c3_i32 : i32
    %125 = arith.addi %17, %124 : i32
    %126 = arith.index_cast %125 : i32 to index
    %c0_43 = arith.constant 0 : index
    %c0_44 = arith.constant 0 : index
    %127 = vector.load %arg7[%126, %c0_43, %c0_44] : memref<8x16x512xf32, #tpu.memory_space<vmem>>, vector<1x16x512xf32>
    %128 = vector.shape_cast %127 : vector<1x16x512xf32> to vector<16x512xf32>
    %129 = arith.truncf %118 : vector<16x128xf32> to vector<16x128xbf16>
    %cst_45 = arith.constant dense<0.000000e+00> : vector<16x512xf32>
    %130 = tpu.matmul %129, %16, %cst_45 {dimension_numbers = #tpu.dot_dimension_numbers<[1], [0], [0], [1], [0, 0, 1, 1], [], []>} : vector<16x128xbf16>, vector<128x512xbf16>, vector<16x512xf32> -> vector<16x512xf32>
    %131 = arith.addf %128, %130 : vector<16x512xf32>
    %132 = vector.extract_strided_slice %131 {offsets = [0, 0], sizes = [16, 256], strides = [1, 1]} : vector<16x512xf32> to vector<16x256xf32>
    %133 = arith.negf %132 : vector<16x256xf32>
    %134 = math.exp %133 : vector<16x256xf32>
    %cst_46 = arith.constant 1.000000e+00 : f32
    %135 = vector.broadcast %cst_46 : f32 to vector<16x256xf32>
    %136 = arith.addf %135, %134 : vector<16x256xf32>
    %137 = arith.divf %135, %136 : vector<16x256xf32>
    %138 = vector.extract_strided_slice %137 {offsets = [0, 0], sizes = [16, 128], strides = [1, 1]} : vector<16x256xf32> to vector<16x128xf32>
    %139 = vector.extract_strided_slice %137 {offsets = [0, 128], sizes = [16, 128], strides = [1, 1]} : vector<16x256xf32> to vector<16x128xf32>
    %140 = vector.extract_strided_slice %131 {offsets = [0, 256], sizes = [16, 128], strides = [1, 1]} : vector<16x512xf32> to vector<16x128xf32>
    %141 = math.tanh %140 : vector<16x128xf32>
    %142 = vector.extract_strided_slice %131 {offsets = [0, 384], sizes = [16, 128], strides = [1, 1]} : vector<16x512xf32> to vector<16x128xf32>
    %143 = arith.negf %142 : vector<16x128xf32>
    %144 = math.exp %143 : vector<16x128xf32>
    %cst_47 = arith.constant 1.000000e+00 : f32
    %145 = vector.broadcast %cst_47 : f32 to vector<16x128xf32>
    %146 = arith.addf %145, %144 : vector<16x128xf32>
    %147 = arith.divf %145, %146 : vector<16x128xf32>
    %148 = arith.mulf %139, %116 : vector<16x128xf32>
    %149 = arith.mulf %138, %141 : vector<16x128xf32>
    %150 = arith.addf %148, %149 : vector<16x128xf32>
    %151 = math.tanh %150 : vector<16x128xf32>
    %152 = arith.mulf %147, %151 : vector<16x128xf32>
    %153 = arith.truncf %152 : vector<16x128xf32> to vector<16x128xbf16>
    %154 = arith.index_cast %125 : i32 to index
    %c0_48 = arith.constant 0 : index
    %c0_49 = arith.constant 0 : index
    %155 = vector.load %arg6[%154, %c0_48, %c0_49] : memref<8x16x128xbf16, #tpu.memory_space<vmem>>, vector<1x16x128xbf16>
    %156 = vector.shape_cast %155 : vector<1x16x128xbf16> to vector<16x128xbf16>
    %157 = vector.shape_cast %153 : vector<16x128xbf16> to vector<1x16x128xbf16>
    tpu.vector_store %arg6[%154, %c0_48, %c0_49], %157 {strides = array<i32>} : memref<8x16x128xbf16, #tpu.memory_space<vmem>>, vector<1x16x128xbf16>,
    %c4_i32 = arith.constant 4 : i32
    %158 = arith.muli %19, %c4_i32 : i32
    %159 = arith.addi %17, %158 : i32
    %160 = arith.index_cast %159 : i32 to index
    %c0_50 = arith.constant 0 : index
    %c0_51 = arith.constant 0 : index
    %161 = vector.load %arg7[%160, %c0_50, %c0_51] : memref<8x16x512xf32, #tpu.memory_space<vmem>>, vector<1x16x512xf32>
    %162 = vector.shape_cast %161 : vector<1x16x512xf32> to vector<16x512xf32>
    %163 = arith.truncf %152 : vector<16x128xf32> to vector<16x128xbf16>
    %cst_52 = arith.constant dense<0.000000e+00> : vector<16x512xf32>
    %164 = tpu.matmul %163, %16, %cst_52 {dimension_numbers = #tpu.dot_dimension_numbers<[1], [0], [0], [1], [0, 0, 1, 1], [], []>} : vector<16x128xbf16>, vector<128x512xbf16>, vector<16x512xf32> -> vector<16x512xf32>
    %165 = arith.addf %162, %164 : vector<16x512xf32>
    %166 = vector.extract_strided_slice %165 {offsets = [0, 0], sizes = [16, 256], strides = [1, 1]} : vector<16x512xf32> to vector<16x256xf32>
    %167 = arith.negf %166 : vector<16x256xf32>
    %168 = math.exp %167 : vector<16x256xf32>
    %cst_53 = arith.constant 1.000000e+00 : f32
    %169 = vector.broadcast %cst_53 : f32 to vector<16x256xf32>
    %170 = arith.addf %169, %168 : vector<16x256xf32>
    %171 = arith.divf %169, %170 : vector<16x256xf32>
    %172 = vector.extract_strided_slice %171 {offsets = [0, 0], sizes = [16, 128], strides = [1, 1]} : vector<16x256xf32> to vector<16x128xf32>
    %173 = vector.extract_strided_slice %171 {offsets = [0, 128], sizes = [16, 128], strides = [1, 1]} : vector<16x256xf32> to vector<16x128xf32>
    %174 = vector.extract_strided_slice %165 {offsets = [0, 256], sizes = [16, 128], strides = [1, 1]} : vector<16x512xf32> to vector<16x128xf32>
    %175 = math.tanh %174 : vector<16x128xf32>
    %176 = vector.extract_strided_slice %165 {offsets = [0, 384], sizes = [16, 128], strides = [1, 1]} : vector<16x512xf32> to vector<16x128xf32>
    %177 = arith.negf %176 : vector<16x128xf32>
    %178 = math.exp %177 : vector<16x128xf32>
    %cst_54 = arith.constant 1.000000e+00 : f32
    %179 = vector.broadcast %cst_54 : f32 to vector<16x128xf32>
    %180 = arith.addf %179, %178 : vector<16x128xf32>
    %181 = arith.divf %179, %180 : vector<16x128xf32>
    %182 = arith.mulf %173, %150 : vector<16x128xf32>
    %183 = arith.mulf %172, %175 : vector<16x128xf32>
    %184 = arith.addf %182, %183 : vector<16x128xf32>
    %185 = math.tanh %184 : vector<16x128xf32>
    %186 = arith.mulf %181, %185 : vector<16x128xf32>
    %187 = arith.truncf %186 : vector<16x128xf32> to vector<16x128xbf16>
    %188 = arith.index_cast %159 : i32 to index
    %c0_55 = arith.constant 0 : index
    %c0_56 = arith.constant 0 : index
    %189 = vector.load %arg6[%188, %c0_55, %c0_56] : memref<8x16x128xbf16, #tpu.memory_space<vmem>>, vector<1x16x128xbf16>
    %190 = vector.shape_cast %189 : vector<1x16x128xbf16> to vector<16x128xbf16>
    %191 = vector.shape_cast %187 : vector<16x128xbf16> to vector<1x16x128xbf16>
    tpu.vector_store %arg6[%188, %c0_55, %c0_56], %191 {strides = array<i32>} : memref<8x16x128xbf16, #tpu.memory_space<vmem>>, vector<1x16x128xbf16>,
    %c5_i32 = arith.constant 5 : i32
    %192 = arith.muli %19, %c5_i32 : i32
    %193 = arith.addi %17, %192 : i32
    %194 = arith.index_cast %193 : i32 to index
    %c0_57 = arith.constant 0 : index
    %c0_58 = arith.constant 0 : index
    %195 = vector.load %arg7[%194, %c0_57, %c0_58] : memref<8x16x512xf32, #tpu.memory_space<vmem>>, vector<1x16x512xf32>
    %196 = vector.shape_cast %195 : vector<1x16x512xf32> to vector<16x512xf32>
    %197 = arith.truncf %186 : vector<16x128xf32> to vector<16x128xbf16>
    %cst_59 = arith.constant dense<0.000000e+00> : vector<16x512xf32>
    %198 = tpu.matmul %197, %16, %cst_59 {dimension_numbers = #tpu.dot_dimension_numbers<[1], [0], [0], [1], [0, 0, 1, 1], [], []>} : vector<16x128xbf16>, vector<128x512xbf16>, vector<16x512xf32> -> vector<16x512xf32>
    %199 = arith.addf %196, %198 : vector<16x512xf32>
    %200 = vector.extract_strided_slice %199 {offsets = [0, 0], sizes = [16, 256], strides = [1, 1]} : vector<16x512xf32> to vector<16x256xf32>
    %201 = arith.negf %200 : vector<16x256xf32>
    %202 = math.exp %201 : vector<16x256xf32>
    %cst_60 = arith.constant 1.000000e+00 : f32
    %203 = vector.broadcast %cst_60 : f32 to vector<16x256xf32>
    %204 = arith.addf %203, %202 : vector<16x256xf32>
    %205 = arith.divf %203, %204 : vector<16x256xf32>
    %206 = vector.extract_strided_slice %205 {offsets = [0, 0], sizes = [16, 128], strides = [1, 1]} : vector<16x256xf32> to vector<16x128xf32>
    %207 = vector.extract_strided_slice %205 {offsets = [0, 128], sizes = [16, 128], strides = [1, 1]} : vector<16x256xf32> to vector<16x128xf32>
    %208 = vector.extract_strided_slice %199 {offsets = [0, 256], sizes = [16, 128], strides = [1, 1]} : vector<16x512xf32> to vector<16x128xf32>
    %209 = math.tanh %208 : vector<16x128xf32>
    %210 = vector.extract_strided_slice %199 {offsets = [0, 384], sizes = [16, 128], strides = [1, 1]} : vector<16x512xf32> to vector<16x128xf32>
    %211 = arith.negf %210 : vector<16x128xf32>
    %212 = math.exp %211 : vector<16x128xf32>
    %cst_61 = arith.constant 1.000000e+00 : f32
    %213 = vector.broadcast %cst_61 : f32 to vector<16x128xf32>
    %214 = arith.addf %213, %212 : vector<16x128xf32>
    %215 = arith.divf %213, %214 : vector<16x128xf32>
    %216 = arith.mulf %207, %184 : vector<16x128xf32>
    %217 = arith.mulf %206, %209 : vector<16x128xf32>
    %218 = arith.addf %216, %217 : vector<16x128xf32>
    %219 = math.tanh %218 : vector<16x128xf32>
    %220 = arith.mulf %215, %219 : vector<16x128xf32>
    %221 = arith.truncf %220 : vector<16x128xf32> to vector<16x128xbf16>
    %222 = arith.index_cast %193 : i32 to index
    %c0_62 = arith.constant 0 : index
    %c0_63 = arith.constant 0 : index
    %223 = vector.load %arg6[%222, %c0_62, %c0_63] : memref<8x16x128xbf16, #tpu.memory_space<vmem>>, vector<1x16x128xbf16>
    %224 = vector.shape_cast %223 : vector<1x16x128xbf16> to vector<16x128xbf16>
    %225 = vector.shape_cast %221 : vector<16x128xbf16> to vector<1x16x128xbf16>
    tpu.vector_store %arg6[%222, %c0_62, %c0_63], %225 {strides = array<i32>} : memref<8x16x128xbf16, #tpu.memory_space<vmem>>, vector<1x16x128xbf16>,
    %c6_i32 = arith.constant 6 : i32
    %226 = arith.muli %19, %c6_i32 : i32
    %227 = arith.addi %17, %226 : i32
    %228 = arith.index_cast %227 : i32 to index
    %c0_64 = arith.constant 0 : index
    %c0_65 = arith.constant 0 : index
    %229 = vector.load %arg7[%228, %c0_64, %c0_65] : memref<8x16x512xf32, #tpu.memory_space<vmem>>, vector<1x16x512xf32>
    %230 = vector.shape_cast %229 : vector<1x16x512xf32> to vector<16x512xf32>
    %231 = arith.truncf %220 : vector<16x128xf32> to vector<16x128xbf16>
    %cst_66 = arith.constant dense<0.000000e+00> : vector<16x512xf32>
    %232 = tpu.matmul %231, %16, %cst_66 {dimension_numbers = #tpu.dot_dimension_numbers<[1], [0], [0], [1], [0, 0, 1, 1], [], []>} : vector<16x128xbf16>, vector<128x512xbf16>, vector<16x512xf32> -> vector<16x512xf32>
    %233 = arith.addf %230, %232 : vector<16x512xf32>
    %234 = vector.extract_strided_slice %233 {offsets = [0, 0], sizes = [16, 256], strides = [1, 1]} : vector<16x512xf32> to vector<16x256xf32>
    %235 = arith.negf %234 : vector<16x256xf32>
    %236 = math.exp %235 : vector<16x256xf32>
    %cst_67 = arith.constant 1.000000e+00 : f32
    %237 = vector.broadcast %cst_67 : f32 to vector<16x256xf32>
    %238 = arith.addf %237, %236 : vector<16x256xf32>
    %239 = arith.divf %237, %238 : vector<16x256xf32>
    %240 = vector.extract_strided_slice %239 {offsets = [0, 0], sizes = [16, 128], strides = [1, 1]} : vector<16x256xf32> to vector<16x128xf32>
    %241 = vector.extract_strided_slice %239 {offsets = [0, 128], sizes = [16, 128], strides = [1, 1]} : vector<16x256xf32> to vector<16x128xf32>
    %242 = vector.extract_strided_slice %233 {offsets = [0, 256], sizes = [16, 128], strides = [1, 1]} : vector<16x512xf32> to vector<16x128xf32>
    %243 = math.tanh %242 : vector<16x128xf32>
    %244 = vector.extract_strided_slice %233 {offsets = [0, 384], sizes = [16, 128], strides = [1, 1]} : vector<16x512xf32> to vector<16x128xf32>
    %245 = arith.negf %244 : vector<16x128xf32>
    %246 = math.exp %245 : vector<16x128xf32>
    %cst_68 = arith.constant 1.000000e+00 : f32
    %247 = vector.broadcast %cst_68 : f32 to vector<16x128xf32>
    %248 = arith.addf %247, %246 : vector<16x128xf32>
    %249 = arith.divf %247, %248 : vector<16x128xf32>
    %250 = arith.mulf %241, %218 : vector<16x128xf32>
    %251 = arith.mulf %240, %243 : vector<16x128xf32>
    %252 = arith.addf %250, %251 : vector<16x128xf32>
    %253 = math.tanh %252 : vector<16x128xf32>
    %254 = arith.mulf %249, %253 : vector<16x128xf32>
    %255 = arith.truncf %254 : vector<16x128xf32> to vector<16x128xbf16>
    %256 = arith.index_cast %227 : i32 to index
    %c0_69 = arith.constant 0 : index
    %c0_70 = arith.constant 0 : index
    %257 = vector.load %arg6[%256, %c0_69, %c0_70] : memref<8x16x128xbf16, #tpu.memory_space<vmem>>, vector<1x16x128xbf16>
    %258 = vector.shape_cast %257 : vector<1x16x128xbf16> to vector<16x128xbf16>
    %259 = vector.shape_cast %255 : vector<16x128xbf16> to vector<1x16x128xbf16>
    tpu.vector_store %arg6[%256, %c0_69, %c0_70], %259 {strides = array<i32>} : memref<8x16x128xbf16, #tpu.memory_space<vmem>>, vector<1x16x128xbf16>,
    %c7_i32_71 = arith.constant 7 : i32
    %260 = arith.muli %19, %c7_i32_71 : i32
    %261 = arith.addi %17, %260 : i32
    %262 = arith.index_cast %261 : i32 to index
    %c0_72 = arith.constant 0 : index
    %c0_73 = arith.constant 0 : index
    %263 = vector.load %arg7[%262, %c0_72, %c0_73] : memref<8x16x512xf32, #tpu.memory_space<vmem>>, vector<1x16x512xf32>
    %264 = vector.shape_cast %263 : vector<1x16x512xf32> to vector<16x512xf32>
    %265 = arith.truncf %254 : vector<16x128xf32> to vector<16x128xbf16>
    %cst_74 = arith.constant dense<0.000000e+00> : vector<16x512xf32>
    %266 = tpu.matmul %265, %16, %cst_74 {dimension_numbers = #tpu.dot_dimension_numbers<[1], [0], [0], [1], [0, 0, 1, 1], [], []>} : vector<16x128xbf16>, vector<128x512xbf16>, vector<16x512xf32> -> vector<16x512xf32>
    %267 = arith.addf %264, %266 : vector<16x512xf32>
    %268 = vector.extract_strided_slice %267 {offsets = [0, 0], sizes = [16, 256], strides = [1, 1]} : vector<16x512xf32> to vector<16x256xf32>
    %269 = arith.negf %268 : vector<16x256xf32>
    %270 = math.exp %269 : vector<16x256xf32>
    %cst_75 = arith.constant 1.000000e+00 : f32
    %271 = vector.broadcast %cst_75 : f32 to vector<16x256xf32>
    %272 = arith.addf %271, %270 : vector<16x256xf32>
    %273 = arith.divf %271, %272 : vector<16x256xf32>
    %274 = vector.extract_strided_slice %273 {offsets = [0, 0], sizes = [16, 128], strides = [1, 1]} : vector<16x256xf32> to vector<16x128xf32>
    %275 = vector.extract_strided_slice %273 {offsets = [0, 128], sizes = [16, 128], strides = [1, 1]} : vector<16x256xf32> to vector<16x128xf32>
    %276 = vector.extract_strided_slice %267 {offsets = [0, 256], sizes = [16, 128], strides = [1, 1]} : vector<16x512xf32> to vector<16x128xf32>
    %277 = math.tanh %276 : vector<16x128xf32>
    %278 = vector.extract_strided_slice %267 {offsets = [0, 384], sizes = [16, 128], strides = [1, 1]} : vector<16x512xf32> to vector<16x128xf32>
    %279 = arith.negf %278 : vector<16x128xf32>
    %280 = math.exp %279 : vector<16x128xf32>
    %cst_76 = arith.constant 1.000000e+00 : f32
    %281 = vector.broadcast %cst_76 : f32 to vector<16x128xf32>
    %282 = arith.addf %281, %280 : vector<16x128xf32>
    %283 = arith.divf %281, %282 : vector<16x128xf32>
    %284 = arith.mulf %275, %252 : vector<16x128xf32>
    %285 = arith.mulf %274, %277 : vector<16x128xf32>
    %286 = arith.addf %284, %285 : vector<16x128xf32>
    %287 = math.tanh %286 : vector<16x128xf32>
    %288 = arith.mulf %283, %287 : vector<16x128xf32>
    %289 = arith.truncf %288 : vector<16x128xf32> to vector<16x128xbf16>
    %290 = arith.index_cast %261 : i32 to index
    %c0_77 = arith.constant 0 : index
    %c0_78 = arith.constant 0 : index
    %291 = vector.load %arg6[%290, %c0_77, %c0_78] : memref<8x16x128xbf16, #tpu.memory_space<vmem>>, vector<1x16x128xbf16>
    %292 = vector.shape_cast %291 : vector<1x16x128xbf16> to vector<16x128xbf16>
    %293 = vector.shape_cast %289 : vector<16x128xbf16> to vector<1x16x128xbf16>
    tpu.vector_store %arg6[%290, %c0_77, %c0_78], %293 {strides = array<i32>} : memref<8x16x128xbf16, #tpu.memory_space<vmem>>, vector<1x16x128xbf16>,
    %c8_i32 = arith.constant 8 : i32
    %c0_79 = arith.constant 0 : index
    %c0_80 = arith.constant 0 : index
    %294 = vector.load %arg8[%c0_79, %c0_80] : memref<16x128xf32, #tpu.memory_space<vmem>>, vector<16x128xf32>
    tpu.vector_store %arg8[%c0_79, %c0_80], %288 {strides = array<i32>} : memref<16x128xf32, #tpu.memory_space<vmem>>, vector<16x128xf32>,
    %c0_81 = arith.constant 0 : index
    %c0_82 = arith.constant 0 : index
    %295 = vector.load %arg9[%c0_81, %c0_82] : memref<16x128xf32, #tpu.memory_space<vmem>>, vector<16x128xf32>
    tpu.vector_store %arg9[%c0_81, %c0_82], %286 {strides = array<i32>} : memref<16x128xf32, #tpu.memory_space<vmem>>, vector<16x128xf32>,
    return
  }
  func.func @transform_0(%arg0: i32, %arg1: i32) -> (i32, i32, i32) {
    %c0_i32 = arith.constant 0 : i32
    %0 = arith.muli %arg0, %c0_i32 : i32
    %c2_i32 = arith.constant 2 : i32
    %1 = arith.muli %c2_i32, %arg0 : i32
    %c1_i32 = arith.constant 1 : i32
    %2 = arith.subi %c1_i32, %1 : i32
    %3 = arith.muli %2, %arg1 : i32
    %4 = arith.addi %0, %3 : i32
    %c0_i32_0 = arith.constant 0 : i32
    %c0_i32_1 = arith.constant 0 : i32
    %c0_i32_2 = arith.constant 0 : i32
    return %4, %c0_i32_0, %c0_i32_1 : i32, i32, i32
  }
  func.func @transform_1(%arg0: i32, %arg1: i32) -> (i32, i32, i32) {
    %c0_i32 = arith.constant 0 : i32
    %c0_i32_0 = arith.constant 0 : i32
    %c0_i32_1 = arith.constant 0 : i32
    return %arg0, %c0_i32, %c0_i32_0 : i32, i32, i32
  }
  func.func @transform_2(%arg0: i32, %arg1: i32) -> (i32, i32, i32) {
    %c0_i32 = arith.constant 0 : i32
    %c0_i32_0 = arith.constant 0 : i32
    %c0_i32_1 = arith.constant 0 : i32
    return %arg0, %c0_i32, %c0_i32_0 : i32, i32, i32
  }
  func.func @transform_3(%arg0: i32, %arg1: i32) -> (i32, i32, i32) {
    %c0_i32 = arith.constant 0 : i32
    %c0_i32_0 = arith.constant 0 : i32
    %c0_i32_1 = arith.constant 0 : i32
    return %arg0, %c0_i32, %c0_i32_0 : i32, i32, i32
  }
  func.func @transform_4(%arg0: i32, %arg1: i32) -> (i32, i32, i32) {
    %c0_i32 = arith.constant 0 : i32
    %0 = arith.muli %arg0, %c0_i32 : i32
    %c2_i32 = arith.constant 2 : i32
    %1 = arith.muli %c2_i32, %arg0 : i32
    %c1_i32 = arith.constant 1 : i32
    %2 = arith.subi %c1_i32, %1 : i32
    %3 = arith.muli %2, %arg1 : i32
    %4 = arith.addi %0, %3 : i32
    %c0_i32_0 = arith.constant 0 : i32
    %c0_i32_1 = arith.constant 0 : i32
    return %4, %c0_i32_0, %arg0 : i32, i32, i32
  }
}

</mosaic_0001>

<bundles_post_ra>
// kernel: tpu_custom_call.1
= control target key start
LH: loop header
LB: loop body
LE: loop exit
PB: predicated region body
PF: predicated region fallthrough
CT: control target
= control target key end

     0   :  { %s4575_s0 = inlined_call_operand.hbm [shape: bf16[8,16,16], index: 0, kind: input, shape index: {}]   ;;  %s4576_s1 = inlined_call_operand.hbm [shape: bf16[2,16,512], index: 1, kind: input, shape index: {}]   ;;  %s4577_s2 = inlined_call_operand.hbm [shape: bf16[2,128,512], index: 2, kind: input, shape index: {}]   ;;  %s4578_s3 = inlined_call_operand.hbm [shape: f32[2,1,512], index: 3, kind: input, shape index: {}]   ;;  %s4579_s4 = inlined_call_operand.hbm [shape: bf16[8,16,256], index: 4, kind: output, shape index: {}]  }
   0x1   :  { %4591 = sst [smem:[#allocation23_spill]] %s4576_s1 }
   0x2   :  { %9 = vsyncpa [#allocation6], 0 }
   0x3   :  { %11 = vsyncpa [#allocation6 + $0x1], 0 }
   0x4   :  { %12 = vsyncpa [#allocation9], 0 }
   0x5   :  { %14 = vsyncpa [#allocation9 + $0x1], 0 }
   0x6   :  { %15 = vsyncpa [#allocation12], 0 }
   0x7   :  { %17 = vsyncpa [#allocation12 + $0x1], 0 }
   0x8   :  { %18 = vsyncpa [#allocation7], 0 }
   0x9   :  { %20 = vsyncpa [#allocation7 + $0x1], 0  ;;  %s3588_s15 = smov 0   ;;  %s3590_s16 = smov 0  }
   0xa   :  { %s3592_s17 = smov 0   ;;  %s3594_s18 = smov 0  }
   0xb   :  { %s3596_s19 = smov 0   ;;  %s3598_s20 = smov 0  }
   0xc LB: > { %4592 = sst [smem:[#allocation18_spill]] %s3535_s17  ;;  %s3619_s21 = sadd.s32 4294967295, %s3547_s20   ;;  %s3547_s20 = sphi %s3598_s20, %s26_s20   ;;  %s3543_s19 = sphi %s3596_s19, %s4623_s19   ;;  %s3539_s18 = sphi %s3594_s18, %s4622_s18   ;;  %s3535_s17 = sphi %s3592_s17, %s4618_s17   ;;  %s3531_s16 = sphi %s3590_s16, %s4621_s16   ;;  %s3527_s15 = sphi %s3588_s15, %s4620_s15  }
   0xd   : > { %4593 = sst [smem:[#allocation19_spill]] %s3547_s20  ;;  %s2645_s22 = sadd.s32 4294967294, %s3547_s20  }
   0xe   : > { %s38_s23 = sadd.s32 1, %s3543_s19  ;;  %s77_s24 = sadd.s32 1, %s3535_s17 }
   0xf   : > { %p40_p0 = scmp.ge.s32.totalorder %s38_s23, 2  ;;  %p84_p1 = scmp.ne.s32.totalorder %s3535_s17, %s3531_s16 }
  0x10   : > { %p85_p2 = scmp.eq.s32.totalorder %s3547_s20, 0  ;;  %p90_p3 = scmp.ne.s32.totalorder %s3531_s16, %s3527_s15 }
  0x11   : > { %s4625_s23 = smov (%p40_p0, %s38_s23), 0  ;;  %p4580_p5 = scmp.eq.s32.totalorder %s3619_s21, 0 }
  0x12   : > { %4594 = sst [smem:[#allocation20_spill]] %s4625_s23  ;;  %p3633_p4 = por %p85_p2, %p84_p1 }
  0x13   : > { %s74_s26 = ssub.s32 %s3543_s19, %s4625_s23  ;;  %p174_p6 = scmp.eq.s32.totalorder %s3619_s21, 1 }
  0x14   : > { %p75_p7 = scmp.eq.s32.totalorder %s74_s26, 0  ;;  %p3643_p8 = por %p4580_p5, %p90_p3 }
  0x15   : > { %p3647_p9 = por %p174_p6, %p84_p1  ;;  %p180_p10 = scmp.eq.s32.totalorder %s2645_s22, 1 }
  0x16   : > { %s3652_s29 = scalar_select %p75_p7, %s3535_s17, %s77_s24  }
  0x17   : > { %s4597_s28 = scalar_select %p3647_p9, 1, 0 }
  0x18   : > { %4598 = sst [smem:[#allocation21_spill]] %s3652_s29  ;;  %p3654_p11 = por %p180_p10, %p90_p3 }
  0x19   : > { %p4581_p13 = scmp.lt.s32.totalorder %s3547_s20, 2  ;;  %s225_s5 = sand.u32 1, %s3547_s20  }
  0x1a   : > { %s4599_s30 = scalar_select %p3654_p11, 1, 0 }
  0x1b   : > { %s3662_s6 = sand.u32 1, %s3535_s17   ;;  %s2833_s8 = sshll.u32 %s3543_s19, 9 }
  0x1c   : > { %4600 = sst [smem:[#allocation22_spill]] %s4599_s30  ;;  %s2654_s7 = sshll.u32 %s3662_s6, 5 }
  0x1d   : > { %s4601_s1 = sld [smem:[#allocation23_spill]]  ;;  %s229_s12 = scalar_lea.vmem [#allocation8], %s2654_s7 }
  0x1e   : > { %s236_s13 = sshll.u32 %s229_s12, 4  ;;  %p3673_p0 = pnand %p4581_p13, %p3633_p4  ;;  %s237_s13 = int_to_ptr.vmem [resolvable:$true] %s236_s13 }
  0x1f   : > { %p2663_p1 = scmp.ge.s32.totalorder %s3547_s20, 1  ;;  %s3678_s22 = scalar_lea.sflag [#allocation9], %s225_s5 }
  0x20   : > { %p4582_p3 = pneg %p3673_p0  ;;  %s3362_s24 = scalar_lea.vmem %s237_s13, 512 }
  0x21   : > { %p3363_p6 = scmp.ne.s32.totalorder %s237_s13, %s3362_s24  ;;  %s3549_s26 = smov [#allocation8]  }
  0x22   : > { %s3367_s25 = sshll.u32 %s3549_s26, 4  ;;  %s3368_s25 = int_to_ptr.vmem [resolvable:$false] %s3367_s25 }
  0x23   : > { %s235_s11 = scalar_lea.hbm %s4601_s1, %s2833_s8  ;;  %p3365_p7 = pnand %p3363_p6, %p4582_p3 }
  0x24   : > { %s3369_s7 = scalar_lea.vmem %s3368_s25, 1024  ;;  %p3370_p4 = scmp.lt.s32.totalorder %s237_s13, %s3368_s25 }
  0x25   : > { %p3366_p10 = pneg %p3365_p7  ;;  %p3371_p12 = scmp.lt.s32.totalorder %s3369_s7, %s3362_s24 }
  0x27   : > { %p3372_p5 = por %p3371_p12, %p3370_p4 }
  0x29   : > { %p3373_p13 = pnand %p3372_p5, %p3366_p10 }
  0x2b   : > { %3376 = shalt.err (!%p3373_p13)
}
  0x2c   : > { %s4584_s8 = smov 256   ;;  %s4585_s5 = smov 16  }
  0x2d   : > { %2926 = dma.hbm_to_vmem [thread:$0]  (!%p3673_p0), %s235_s11, 512, %s237_s13, %s3678_s22, %s4584_s8, %s4584_s8, %s4585_s5  }
  0x2e   : > { %p284_p6 = scmp.lt.s32.totalorder %s3547_s20, 3  ;;  %s3552_s10 = smov [#allocation5]  }
  0x2f   : > { %s215_s12 = sshll.u32 %s3552_s10, 4  ;;  %p4604_p5 = scmp.lt.s32.totalorder %s3547_s20, 2  ;;  %s216_s12 = int_to_ptr.vmem [resolvable:$true] %s215_s12 }
  0x30   : > { %p3694_p7 = pnand %p2663_p1, %p284_p6  ;;  %s2657_s26 = sshll.u32 %s3662_s6, 8 }
  0x31   : > { %p3702_p12 = pnand %p4604_p5, %p85_p2  ;;  %s3388_s11 = scalar_lea.vmem %s216_s12, 1024 }
  0x32   : > { %p3389_p10 = scmp.ne.s32.totalorder %s216_s12, %s3388_s11  ;;  %s3395_s13 = scalar_lea.vmem %s216_s12, 2048 }
  0x33   : > { %p3379_p13 = pneg %p3702_p12  ;;  %p3396_p6 = scmp.lt.s32.totalorder %s216_s12, %s216_s12 }
  0x34   : > { %p3397_p3 = scmp.lt.s32.totalorder %s3395_s13, %s3388_s11 }
  0x35   : > { %p3391_p4 = pnand %p3389_p10, %p3379_p13 }
  0x36   : > { %p3398_p11 = por %p3397_p3, %p3396_p6 }
  0x37   : > { %p3392_p1 = pneg %p3391_p4 }
  0x39   : > { %p3399_p9 = pnand %p3398_p11, %p3392_p1 }
  0x3b   : > { %3402 = shalt.err (!%p3399_p9)
}
  0x3c   : > { %s3553_s25 = smov 64   ;;  %s3554_s7 = smov 4  }
  0x3d   : > { %2923 = dma.hbm_to_vmem [thread:$0]  (!%p3702_p12), %s4575_s0, 1024, %s216_s12, [#allocation6], %s3553_s25, %s3553_s25, %s3554_s7  }
  0x3e   : > { %s2834_s5 = sshll.u32 %s3543_s19, 12  ;;  %s250_s17 = scalar_lea.vmem [#allocation10], %s2657_s26 }
  0x3f   : > { %s256_s29 = scalar_lea.hbm %s4577_s2, %s2834_s5  ;;  %s257_s11 = sshll.u32 %s250_s17, 4  ;;  %s258_s11 = int_to_ptr.vmem [resolvable:$true] %s257_s11 }
  0x40   : > { %s3416_s13 = scalar_lea.vmem %s258_s11, 4096  ;;  %p4606_p9 = pneg %p3673_p0 }
  0x41   : > { %p3417_p2 = scmp.ne.s32.totalorder %s258_s11, %s3416_s13  ;;  %s3555_s20 = smov [#allocation10]  }
  0x42   : > { %s3421_s24 = sshll.u32 %s3555_s20, 4  ;;  %s3422_s24 = int_to_ptr.vmem [resolvable:$false] %s3421_s24 }
  0x43   : > { %p3419_p11 = pnand %p3417_p2, %p4606_p9  ;;  %s3423_s30 = scalar_lea.vmem %s3422_s24, 8192 }
  0x44   : > { %p3424_p5 = scmp.lt.s32.totalorder %s258_s11, %s3422_s24  ;;  %p3425_p12 = scmp.lt.s32.totalorder %s3423_s30, %s3416_s13 }
  0x45   : > { %p3420_p3 = pneg %p3419_p11 }
  0x46   : > { %p3426_p13 = por %p3425_p12, %p3424_p5 }
  0x48   : > { %p3427_p10 = pnand %p3426_p13, %p3420_p3 }
  0x4a   : > { %3430 = shalt.err (!%p3427_p10)
}
  0x4b   : > { %s4607_s1 = smov 16   ;;  %s4608_s17 = smov 256  }
  0x4c   : > { %2929 = dma.hbm_to_vmem [thread:$0]  (!%p3673_p0), %s256_s29, 4096, %s258_s11, %s3678_s22, %s4608_s17, %s4608_s17, %s4607_s1  }
  0x4d   : > { %s2660_s23 = sshll.u32 %s3662_s6, 2  ;;  %s2835_s20 = sshll.u32 %s3543_s19, 6 }
  0x4e   : > { %s277_s30 = scalar_lea.hbm %s4578_s3, %s2835_s20  ;;  %s271_s12 = scalar_lea.vmem [#allocation11], %s2660_s23 }
  0x4f   : > { %s279_s26 = sshll.u32 %s271_s12, 4  ;;  %s268_s25 = scalar_lea.sflag [#allocation12], %s3662_s6  ;;  %s280_s26 = int_to_ptr.vmem [resolvable:$true] %s279_s26 }
  0x50   : > { %s3444_s7 = scalar_lea.vmem %s280_s26, 64  ;;  %p4609_p1 = pmov %p4606_p9 }
  0x51   : > { %p3445_p4 = scmp.ne.s32.totalorder %s280_s26, %s3444_s7  ;;  %s3556_s10 = smov [#allocation11]  }
  0x52   : > { %s3449_s13 = sshll.u32 %s3556_s10, 4  ;;  %s3450_s13 = int_to_ptr.vmem [resolvable:$false] %s3449_s13 }
  0x53   : > { %p3447_p6 = pnand %p3445_p4, %p4609_p1  ;;  %s3451_s29 = scalar_lea.vmem %s3450_s13, 128 }
  0x54   : > { %p3452_p9 = scmp.lt.s32.totalorder %s280_s26, %s3450_s13  ;;  %p3453_p11 = scmp.lt.s32.totalorder %s3451_s29, %s3444_s7 }
  0x55   : > { %p3448_p2 = pneg %p3447_p6 }
  0x56   : > { %p3454_p3 = por %p3453_p11, %p3452_p9 }
  0x58   : > { %p3455_p5 = pnand %p3454_p3, %p3448_p2 }
  0x5a   : > { %3458 = shalt.err (!%p3455_p5)
}
  0x5b   : > { %2932 = dma.hbm_to_vmem [thread:$0]  (!%p3673_p0), %s277_s30, 64, %s280_s26, %s268_s25  }
  0x5c   : > { %288 = sbr.rel (%p3694_p7) target bundleno = 2237 (0x8bd), region = 36  ;;  %p4610_p12 = scmp.eq.s32.totalorder (!%p3694_p7), %s3619_s21, 0 }
  0x61   : > { %3510 = dma.done.wait (%p4610_p12), [#allocation6], 1024   ;;  %p4611_p13 = pmov %p4610_p12 }
  0x62   : > { %s299_s6 = sand.u32 1, %s3619_s21   ;;  %s3746_s22 = sand.u32 1, %s3531_s16  }
  0x63   : > { %3512 = vsyncadd (%p4611_p13), [#allocation6], 4294966272  ;;  %s2665_s11 = sshll.u32 %s3746_s22, 5  ;;  %s300_s24 = scalar_lea.sflag [#allocation9], %s299_s6 }
  0x64   : > { %s303_s14 = scalar_lea.vmem [#allocation8], %s2665_s11 }
  0x65   : > { %3514 = dma.done.wait (%p3643_p8), %s300_s24, 4608  }
  0x66   : > { %3516 = vsyncadd (%p3643_p8), %s300_s24, 4294962688  ;;  %s2666_s9 = sshll.u32 %s3746_s22, 8  ;;  %s2667_s1 = sshll.u32 %s3746_s22, 2 }
  0x67   : > { %s3755_s17 = scalar_lea.vmem [#allocation10], %s2666_s9  ;;  %s318_s21 = scalar_lea.sflag [#allocation12], %s3746_s22 }
  0x68   : > { %s3758_s23 = scalar_lea.vmem [#allocation11], %s2667_s1 }
  0x69   : > { %3518 = dma.done.wait (%p3643_p8), %s318_s21, 64  }
  0x6a   : > { %3520 = vsyncadd (%p3643_p8), %s318_s21, 4294967232  ;;  %v3557_v0 = vmov 0   ;;  %v2999_v1 = vld [vmem:[%s303_s14 + $0x4] ss:$16 sps:$4 sm:$0xff]   ;;  %v3001_v2 = vld [vmem:[%s303_s14 + $0xc] ss:$16 sps:$4 sm:$0xff]   ;;  %v711_v46 = vlaneseq }
  0x6b   : > { %515 = vmatprep.mubr.bf16.mxu0 %v3557_v0  ;;  %628 = vmatprep.mubr.bf16.mxu1 %v3557_v0  ;;  %v3003_v3 = vld [vmem:[%s303_s14] ss:$16 sps:$4 sm:$0xff]   ;;  %v3004_v4 = vld [vmem:[%s303_s14 + $0x8] ss:$16 sps:$4 sm:$0xff]   ;;  %vm458_vm0 = vcmask 130048   ;;  %v3558_v45 = vmov 0.0|0.0  }
  0x6c   : > { %497 = vmatprep.subr.bf16.mxu0 %v2999_v1  ;;  %610 = vmatprep.subr.bf16.mxu1 %v3001_v2  ;;  %v3005_v5 = vld [vmem:[#allocation5] sm:$0xff]   ;;  %v3789_v11 = vld [vmem:[%s3755_s17 + $0xec] ss:$16 sps:$4 sm:$0xff]   ;;  %v3792_v12 = vld [vmem:[%s3755_s17 + $0xe8] ss:$16 sps:$4 sm:$0xff]   ;;  %s2697_s27 = sshll.u32 %s3539_s18, 1 }
  0x6d   : > { %498 = vmatpush1.bf16.msra.mxu0 %v3003_v3  ;;  %611 = vmatpush1.bf16.msra.mxu1 %v3004_v4  ;;  %v3767_v6 = vld [vmem:[%s3755_s17 + $0xe4] ss:$16 sps:$4 sm:$0xff]   ;;  %v3770_v7 = vld [vmem:[%s3755_s17 + $0xe0] ss:$16 sps:$4 sm:$0xff]   ;;  %v3009_v13 = vld [vmem:[#allocation5 + $0x8] sm:$0xff]   ;;  %s3963_s20 = ssub.s32 1, %s2697_s27 }
  0x6e   : > { %1070 = vmatprep.subr.bf16.mxu0 %v3767_v6  ;;  %v3774_v8 = vld [vmem:[%s3755_s17 + $0xc4] ss:$16 sps:$4 sm:$0xff]   ;;  %v3781_v9 = vld [vmem:[%s3755_s17 + $0xc0] ss:$16 sps:$4 sm:$0xff]   ;;  %1113 = vmatprep.subr.bf16.mxu1 %v3789_v11  ;;  %v3805_v16 = vld [vmem:[%s3755_s17 + $0xcc] ss:$16 sps:$4 sm:$0xff]  }
  0x6f   : > { %v3786_v10 = vld [vmem:[%s3755_s17 + $0xa4] ss:$16 sps:$4 sm:$0xff]   ;;  %v3796_v14 = vld [vmem:[%s3755_s17 + $0xa0] ss:$16 sps:$4 sm:$0xff]   ;;  %v3808_v17 = vld [vmem:[%s3755_s17 + $0xc8] ss:$16 sps:$4 sm:$0xff]  }
  0x70   : > { %2681 = vmatmul.mubr.msk.bf16.vlgmr.msra.gmra.mxu0 %vm458_vm0, %v3005_v5  ;;  %2689 = vmatmul.mubr.msk.bf16.vlgmr.msra.gmra.mxu1 %vm458_vm0, %v3005_v5  ;;  %v3802_v15 = vld [vmem:[%s3755_s17 + $0x84] ss:$16 sps:$4 sm:$0xff]   ;;  %v3815_v18 = vld [vmem:[%s3755_s17 + $0x80] ss:$16 sps:$4 sm:$0xff]   ;;  %v3823_v20 = vld [vmem:[%s3755_s17 + $0xac] ss:$16 sps:$4 sm:$0xff]  }
  0x71   : > { %1071 = vmatpush1.bf16.msra.mxu0 %v3770_v7  ;;  %525 = vmatprep.mubr.bf16.mxu0 %v3557_v0  ;;  %v3818_v19 = vld [vmem:[%s3755_s17 + $0x64] ss:$16 sps:$4 sm:$0xff]   ;;  %v3828_v21 = vld [vmem:[%s3755_s17 + $0xa8] ss:$16 sps:$4 sm:$0xff]   ;;  %v3832_v23 = vld [vmem:[%s3755_s17 + $0x60] ss:$16 sps:$4 sm:$0xff]  }
  0x72   : > { %638 = vmatprep.mubr.bf16.mxu1 %v3557_v0  ;;  %1072 = vmatprep.subr.bf16.mxu0 %v3774_v8  ;;  %v3013_v22 = vld [vmem:[#allocation5 + $0x10] sm:$0xff]   ;;  %v3839_v25 = vld [vmem:[%s3755_s17 + $0x8c] ss:$16 sps:$4 sm:$0xff]   ;;  %v3844_v26 = vld [vmem:[%s3755_s17 + $0x88] ss:$16 sps:$4 sm:$0xff]   ;;  %s3966_s8 = smul.u32 7, %s3539_s18 }
  0x73   : > { %1114 = vmatpush1.bf16.msra.mxu1 %v3792_v12  ;;  %v3836_v24 = vld [vmem:[%s3755_s17 + $0x44] ss:$16 sps:$4 sm:$0xff]   ;;  %v3852_v27 = vld [vmem:[%s3755_s17 + $0x40] ss:$16 sps:$4 sm:$0xff]   ;;  %v3856_v28 = vld [vmem:[%s3755_s17 + $0x6c] ss:$16 sps:$4 sm:$0xff]  }
  0x74   : > { %1115 = vmatprep.subr.bf16.mxu1 %v3805_v16  ;;  %v3861_v29 = vld [vmem:[%s3755_s17 + $0x24] ss:$16 sps:$4 sm:$0xff]   ;;  %v3864_v30 = vld [vmem:[%s3755_s17 + $0x68] ss:$16 sps:$4 sm:$0xff]   ;;  %v3868_v32 = vld [vmem:[%s3755_s17 + $0x20] ss:$16 sps:$4 sm:$0xff]  }
  0x75   : > { %1073 = vmatpush1.bf16.msra.mxu0 %v3781_v9  ;;  %v3020_v31 = vld [vmem:[#allocation5 + $0x18] sm:$0xff]   ;;  %v3880_v35 = vld [vmem:[%s3755_s17 + $0x4] ss:$16 sps:$4 sm:$0xff]   ;;  %v3892_v37 = vld [vmem:[%s3755_s17] ss:$16 sps:$4 sm:$0xff]   ;;  %s1896_s5 = smul.u32 5, %s3963_s20 }
  0x76   : > { %1074 = vmatprep.subr.bf16.mxu0 %v3786_v10  ;;  %v3872_v33 = vld [vmem:[%s3755_s17 + $0x4c] ss:$16 sps:$4 sm:$0xff]   ;;  %v3877_v34 = vld [vmem:[%s3755_s17 + $0x48] ss:$16 sps:$4 sm:$0xff]   ;;  %v3027_v39 = vld [vmem:[#allocation5 + $0x20] sm:$0xff]   ;;  %s2064_s30 = smul.u32 6, %s3963_s20 }
  0x77   : > { %1116 = vmatpush1.bf16.msra.mxu1 %v3808_v17  ;;  %v3885_v36 = vld [vmem:[%s3755_s17 + $0x2c] ss:$16 sps:$4 sm:$0xff]   ;;  %v3897_v38 = vld [vmem:[%s3755_s17 + $0x28] ss:$16 sps:$4 sm:$0xff]   ;;  %v3041_v43 = vld [vmem:[#allocation5 + $0x30] sm:$0xff]   ;;  %s3971_s12 = sadd.s32 %s1896_s5, %s3966_s8  ;;  %s2232_s26 = smul.u32 7, %s3963_s20 }
  0x78   : > { %2682 = vmatmul.mubr.msk.bf16.gmra.mxu0 %vm458_vm0, %v3009_v13  ;;  %2690 = vmatmul.mubr.msk.bf16.gmra.mxu1 %vm458_vm0, %v3009_v13  ;;  %v3902_v40 = vld [vmem:[%s3755_s17 + $0xc] ss:$16 sps:$4 sm:$0xff]   ;;  %v3906_v41 = vld [vmem:[%s3755_s17 + $0x8] ss:$16 sps:$4 sm:$0xff]   ;;  %s3975_s25 = sadd.s32 %s2064_s30, %s3966_s8  ;;  %s2754_s10 = sshll.u32 %s3963_s20, 1  ;;  %v712_v47 = vshrl.u32 %v711_v46, 7 }
  0x79   : > { %535 = vmatprep.mubr.bf16.mxu0 %v3557_v0  ;;  %648 = vmatprep.mubr.bf16.mxu1 %v3557_v0  ;;  %v3034_v42 = vld [vmem:[#allocation5 + $0x28] sm:$0xff]   ;;  %v3051_v44 = vld [vmem:[#allocation5 + $0x38] sm:$0xff]   ;;  %s3978_s7 = sadd.s32 %s2232_s26, %s3966_s8  ;;  %s3982_s13 = sadd.s32 %s2754_s10, %s3966_s8  ;;  %v709_v50 = vld [vmem:[%s3758_s23] sm:$0xf] }
  0x7a   : > { %1075 = vmatpush1.bf16.msra.mxu0 %v3796_v14  ;;  %1117 = vmatprep.subr.bf16.mxu1 %v3823_v20  ;;  %s1560_s29 = smul.u32 3, %s3963_s20  ;;  %s2779_s6 = sshll.u32 %s3963_s20, 2  ;;  %v713_v48 = vsub.s32 0, %v712_v47  ;;  %v721_v49 = vsub.s32 2, %v712_v47  ;;  %v717_v51 = vsub.s32 1, %v712_v47  ;;  %v725_v52 = vsub.s32 3, %v712_v47 }
  0x7b   : > { %1076 = vmatprep.subr.bf16.mxu0 %v3802_v15  ;;  %1118 = vmatpush1.bf16.msra.mxu1 %v3828_v21  ;;  %s3990_s24 = sadd.s32 %s2779_s6, %s3966_s8  ;;  %s2836_s14 = smul.u32 448, %s3539_s18 }
  0x7c   : > { %1119 = vmatprep.subr.bf16.mxu1 %v3839_v25  ;;  %s3987_s11 = sadd.s32 %s1560_s29, %s3966_s8  ;;  %v3993_v53 = vrot.slane %v709_v50, %v713_v48  ;;  %v3995_v54 = vrot.slane %v709_v50, %v721_v49  ;;  %v3997_v55 = vrot.slane %v709_v50, %v717_v51  ;;  %v3999_v56 = vrot.slane %v709_v50, %v725_v52  ;;  %s2668_s1 = sshll.u32 %s3746_s22, 6 }
  0x7d   : > { %s900_s9 = scalar_lea.vmem [#allocation2], %s2836_s14  ;;  %s2839_s21 = smul.u32 56, %s3539_s18 }
  0x7e   : > { %1077 = vmatpush1.bf16.msra.mxu0 %v3815_v18  ;;  %s4074_s23 = scalar_lea.vmem [#allocation13], %s2668_s1  ;;  %s4116_s5 = sadd.s32 %s3963_s20, %s3966_s8 }
  0x7f   : > { %1078 = vmatprep.subr.bf16.mxu0 %v3818_v19  ;;  %1120 = vmatpush1.bf16.msra.mxu1 %v3844_v26  ;;  %s1222_s27 = scalar_lea.vmem %s4074_s23, %s2839_s21 [#allocation13]  ;;  %s2840_s30 = sshll.u32 %s4116_s5, 6 }
  0x80   : > { %2683 = vmatmul.mubr.msk.bf16.gmra.mxu0 %vm458_vm0, %v3013_v22  ;;  %2691 = vmatmul.mubr.msk.bf16.gmra.mxu1 %vm458_vm0, %v3013_v22  ;;  %s4119_s26 = scalar_lea.vmem [#allocation2], %s2840_s30  ;;  %s2843_s20 = sshll.u32 %s4116_s5, 3 }
  0x81   : > { %545 = vmatprep.mubr.bf16.mxu0 %v3557_v0  ;;  %658 = vmatprep.mubr.bf16.mxu1 %v3557_v0  ;;  %s1389_s8 = scalar_lea.vmem %s4074_s23, %s2843_s20 [#allocation13]  ;;  %s2844_s10 = sshll.u32 %s3982_s13, 6 }
  0x82   : > { %1079 = vmatpush1.bf16.msra.mxu0 %v3832_v23  ;;  %1121 = vmatprep.subr.bf16.mxu1 %v3856_v28  ;;  %s4267_s29 = scalar_lea.vmem [#allocation2], %s2844_s10  ;;  %s2863_s10 = sshll.u32 %s3975_s25, 3 }
  0x83   : > { %1080 = vmatprep.subr.bf16.mxu0 %v3836_v24  ;;  %1122 = vmatpush1.bf16.msra.mxu1 %v3864_v30  ;;  %p4612_p0 = scmp.ne.s32.totalorder %s4597_s28, 0 }
  0x84   : > { %1123 = vmatprep.subr.bf16.mxu1 %v3872_v33 }
  0x86   : > { %1081 = vmatpush1.bf16.msra.mxu0 %v3852_v27 }
  0x87   : > { %1082 = vmatprep.subr.bf16.mxu0 %v3861_v29  ;;  %1124 = vmatpush1.bf16.msra.mxu1 %v3877_v34 }
  0x88   : > { %2684 = vmatmul.mubr.msk.bf16.gmra.mxu0 %vm458_vm0, %v3020_v31  ;;  %2692 = vmatmul.mubr.msk.bf16.gmra.mxu1 %vm458_vm0, %v3020_v31 }
  0x89   : > { %555 = vmatprep.mubr.bf16.mxu0 %v3557_v0  ;;  %668 = vmatprep.mubr.bf16.mxu1 %v3557_v0 }
  0x8a   : > { %1083 = vmatpush1.bf16.msra.mxu0 %v3868_v32  ;;  %1125 = vmatprep.subr.bf16.mxu1 %v3885_v36 }
  0x8b   : > { %1084 = vmatprep.subr.bf16.mxu0 %v3880_v35  ;;  %1126 = vmatpush1.bf16.msra.mxu1 %v3897_v38 }
  0x8c   : > { %1127 = vmatprep.subr.bf16.mxu1 %v3902_v40 }
  0x8e   : > { %1085 = vmatpush1.bf16.msra.mxu0 %v3892_v37 }
  0x8f   : > { %1237 = vmatprep.subr.bf16.mxu0 %v3767_v6  ;;  %1128 = vmatpush1.bf16.msra.mxu1 %v3906_v41 }
  0x90   : > { %2685 = vmatmul.mubr.msk.bf16.gmra.mxu0 %vm458_vm0, %v3027_v39  ;;  %2693 = vmatmul.mubr.msk.bf16.gmra.mxu1 %vm458_vm0, %v3027_v39 }
  0x91   : > { %565 = vmatprep.mubr.bf16.mxu0 %v3557_v0  ;;  %678 = vmatprep.mubr.bf16.mxu1 %v3557_v0 }
  0x92   : > { %1280 = vmatprep.subr.bf16.mxu1 %v3789_v11 }
  0x98   : > { %2686 = vmatmul.mubr.msk.bf16.gmra.mxu0 %vm458_vm0, %v3034_v42  ;;  %2694 = vmatmul.mubr.msk.bf16.gmra.mxu1 %vm458_vm0, %v3034_v42 }
  0x99   : > { %575 = vmatprep.mubr.bf16.mxu0 %v3557_v0  ;;  %688 = vmatprep.mubr.bf16.mxu1 %v3557_v0 }
  0xa0   : > { %2687 = vmatmul.mubr.msk.bf16.gmra.mxu0 %vm458_vm0, %v3041_v43  ;;  %2695 = vmatmul.mubr.msk.bf16.gmra.mxu1 %vm458_vm0, %v3041_v43 }
  0xa1   : > { %585 = vmatprep.mubr.bf16.mxu0 %v3557_v0  ;;  %698 = vmatprep.mubr.bf16.mxu1 %v3557_v0 }
  0xa8   : > { %2688 = vmatmul.mubr.msk.bf16.gmra.mxu0 %vm458_vm0, %v3051_v44  ;;  %2696 = vmatmul.mubr.msk.bf16.gmra.mxu1 %vm458_vm0, %v3051_v44 }
  0xa9   : > { %1102 = vmatprep.mubr.bf16.mxu0 %v3557_v0  ;;  %1145 = vmatprep.mubr.bf16.mxu1 %v3557_v0 }
  0xb0   : > { %1103 = vmatmul.mubr.bf16.vlgmr.msra.gmra.mxu0 %v3558_v45  ;;  %1146 = vmatmul.mubr.bf16.vlgmr.msra.gmra.mxu1 %v3558_v45 }
  0xb1   : > { %1238 = vmatpush1.bf16.msra.mxu0 %v3770_v7  ;;  %1281 = vmatpush1.bf16.msra.mxu1 %v3792_v12 }
  0xb2   : > { %1239 = vmatprep.subr.bf16.mxu0 %v3774_v8  ;;  %1282 = vmatprep.subr.bf16.mxu1 %v3805_v16 }
  0xb3   : > { %1269 = vmatprep.mubr.bf16.mxu0 %v3557_v0  ;;  %1312 = vmatprep.mubr.bf16.mxu1 %v3557_v0 }
  0xb5   : > { %1240 = vmatpush1.bf16.msra.mxu0 %v3781_v9  ;;  %1283 = vmatpush1.bf16.msra.mxu1 %v3808_v17 }
  0xb6   : > { %1241 = vmatprep.subr.bf16.mxu0 %v3786_v10  ;;  %1284 = vmatprep.subr.bf16.mxu1 %v3823_v20 }
  0xb9   : > { %1242 = vmatpush1.bf16.msra.mxu0 %v3796_v14  ;;  %1285 = vmatpush1.bf16.msra.mxu1 %v3828_v21 }
  0xba   : > { %1243 = vmatprep.subr.bf16.mxu0 %v3802_v15  ;;  %1286 = vmatprep.subr.bf16.mxu1 %v3839_v25 }
  0xbd   : > { %1244 = vmatpush1.bf16.msra.mxu0 %v3815_v18  ;;  %1287 = vmatpush1.bf16.msra.mxu1 %v3844_v26 }
  0xbe   : > { %1245 = vmatprep.subr.bf16.mxu0 %v3818_v19  ;;  %1288 = vmatprep.subr.bf16.mxu1 %v3856_v28 }
  0xc1   : > { %1246 = vmatpush1.bf16.msra.mxu0 %v3832_v23  ;;  %1289 = vmatpush1.bf16.msra.mxu1 %v3864_v30 }
  0xc2   : > { %1247 = vmatprep.subr.bf16.mxu0 %v3836_v24  ;;  %1290 = vmatprep.subr.bf16.mxu1 %v3872_v33 }
  0xc5   : > { %1248 = vmatpush1.bf16.msra.mxu0 %v3852_v27  ;;  %1291 = vmatpush1.bf16.msra.mxu1 %v3877_v34 }
  0xc6   : > { %1249 = vmatprep.subr.bf16.mxu0 %v3861_v29  ;;  %1292 = vmatprep.subr.bf16.mxu1 %v3885_v36 }
  0xc9   : > { %1250 = vmatpush1.bf16.msra.mxu0 %v3868_v32  ;;  %1293 = vmatpush1.bf16.msra.mxu1 %v3897_v38 }
  0xca   : > { %1251 = vmatprep.subr.bf16.mxu0 %v3880_v35  ;;  %1294 = vmatprep.subr.bf16.mxu1 %v3902_v40 }
  0xcd   : > { %1252 = vmatpush1.bf16.msra.mxu0 %v3892_v37  ;;  %1295 = vmatpush1.bf16.msra.mxu1 %v3906_v41 }
  0xce   : > { %1405 = vmatprep.subr.bf16.mxu0 %v3767_v6  ;;  %1448 = vmatprep.subr.bf16.mxu1 %v3789_v11 }
 0x130   : > { %v517_v57 = vpop.f32.mrf.mxu0  ;;  %v630_v58 = vpop.f32.mrf.mxu1 }
 0x131   : > { %v731_v59 = vadd.f32 %v3993_v53, %v517_v57  ;;  %v733_v60 = vadd.f32 %v3995_v54, %v630_v58 }
 0x132   : > { %v519_v61 = vpop.f32.mrf.mxu0  ;;  %v632_v62 = vpop.f32.mrf.mxu1 }
 0x133   : > { %795 = vst [vmem:[#allocation2] sm:$0xff] %v731_v59  ;;  %797 = vst [vmem:[#allocation2 + $0x10] sm:$0xff] %v733_v60  ;;  %v732_v63 = vadd.f32 %v3997_v55, %v519_v61  ;;  %v734_v1 = vadd.f32 %v3999_v56, %v632_v62 }
 0x134   : > { %v521_v2 = vpop.f32.mrf.mxu0  ;;  %v634_v3 = vpop.f32.mrf.mxu1 }
 0x135   : > { %796 = vst [vmem:[#allocation2 + $0x8] sm:$0xff] %v732_v63  ;;  %798 = vst [vmem:[#allocation2 + $0x18] sm:$0xff] %v734_v1  ;;  %v735_v4 = vadd.f32 %v3993_v53, %v521_v2  ;;  %v737_v5 = vadd.f32 %v3995_v54, %v634_v3 }
 0x136   : > { %v523_v6 = vpop.f32.mrf.mxu0  ;;  %v636_v13 = vpop.f32.mrf.mxu1 }
 0x137   : > { %799 = vst [vmem:[#allocation2 + $0x20] sm:$0xff] %v735_v4  ;;  %801 = vst [vmem:[#allocation2 + $0x30] sm:$0xff] %v737_v5  ;;  %v736_v22 = vadd.f32 %v3997_v55, %v523_v6  ;;  %v738_v31 = vadd.f32 %v3999_v56, %v636_v13 }
 0x138   : > { %v527_v39 = vpop.f32.mrf.mxu0  ;;  %v640_v42 = vpop.f32.mrf.mxu1 }
 0x139   : > { %800 = vst [vmem:[#allocation2 + $0x28] sm:$0xff] %v736_v22  ;;  %802 = vst [vmem:[#allocation2 + $0x38] sm:$0xff] %v738_v31  ;;  %v739_v43 = vadd.f32 %v3993_v53, %v527_v39  ;;  %v741_v44 = vadd.f32 %v3995_v54, %v640_v42 }
 0x13a   : > { %v529_v45 = vpop.f32.mrf.mxu0  ;;  %v642_v46 = vpop.f32.mrf.mxu1 }
 0x13b   : > { %803 = vst [vmem:[#allocation2 + $0x40] sm:$0xff] %v739_v43  ;;  %805 = vst [vmem:[#allocation2 + $0x50] sm:$0xff] %v741_v44  ;;  %v740_v47 = vadd.f32 %v3997_v55, %v529_v45  ;;  %v742_v48 = vadd.f32 %v3999_v56, %v642_v46 }
 0x13c   : > { %v531_v49 = vpop.f32.mrf.mxu0  ;;  %v644_v50 = vpop.f32.mrf.mxu1 }
 0x13d   : > { %804 = vst [vmem:[#allocation2 + $0x48] sm:$0xff] %v740_v47  ;;  %806 = vst [vmem:[#allocation2 + $0x58] sm:$0xff] %v742_v48  ;;  %v743_v51 = vadd.f32 %v3993_v53, %v531_v49  ;;  %v745_v52 = vadd.f32 %v3995_v54, %v644_v50 }
 0x13e   : > { %v533_v57 = vpop.f32.mrf.mxu0  ;;  %v646_v58 = vpop.f32.mrf.mxu1 }
 0x13f   : > { %807 = vst [vmem:[#allocation2 + $0x60] sm:$0xff] %v743_v51  ;;  %809 = vst [vmem:[#allocation2 + $0x70] sm:$0xff] %v745_v52  ;;  %v744_v59 = vadd.f32 %v3997_v55, %v533_v57  ;;  %v746_v60 = vadd.f32 %v3999_v56, %v646_v58 }
 0x140   : > { %v537_v61 = vpop.f32.mrf.mxu0  ;;  %v650_v62 = vpop.f32.mrf.mxu1 }
 0x141   : > { %808 = vst [vmem:[#allocation2 + $0x68] sm:$0xff] %v744_v59  ;;  %810 = vst [vmem:[#allocation2 + $0x78] sm:$0xff] %v746_v60  ;;  %v747_v63 = vadd.f32 %v3993_v53, %v537_v61  ;;  %v749_v1 = vadd.f32 %v3995_v54, %v650_v62 }
 0x142   : > { %v539_v2 = vpop.f32.mrf.mxu0  ;;  %v652_v3 = vpop.f32.mrf.mxu1 }
 0x143   : > { %811 = vst [vmem:[#allocation2 + $0x80] sm:$0xff] %v747_v63  ;;  %813 = vst [vmem:[#allocation2 + $0x90] sm:$0xff] %v749_v1  ;;  %v748_v4 = vadd.f32 %v3997_v55, %v539_v2  ;;  %v750_v5 = vadd.f32 %v3999_v56, %v652_v3 }
 0x144   : > { %v541_v6 = vpop.f32.mrf.mxu0  ;;  %v654_v13 = vpop.f32.mrf.mxu1 }
 0x145   : > { %812 = vst [vmem:[#allocation2 + $0x88] sm:$0xff] %v748_v4  ;;  %814 = vst [vmem:[#allocation2 + $0x98] sm:$0xff] %v750_v5  ;;  %v751_v22 = vadd.f32 %v3993_v53, %v541_v6  ;;  %v753_v31 = vadd.f32 %v3995_v54, %v654_v13 }
 0x146   : > { %v543_v39 = vpop.f32.mrf.mxu0  ;;  %v656_v42 = vpop.f32.mrf.mxu1 }
 0x147   : > { %815 = vst [vmem:[#allocation2 + $0xa0] sm:$0xff] %v751_v22  ;;  %817 = vst [vmem:[#allocation2 + $0xb0] sm:$0xff] %v753_v31  ;;  %v752_v43 = vadd.f32 %v3997_v55, %v543_v39  ;;  %v754_v44 = vadd.f32 %v3999_v56, %v656_v42 }
 0x148   : > { %v547_v45 = vpop.f32.mrf.mxu0  ;;  %v660_v46 = vpop.f32.mrf.mxu1 }
 0x149   : > { %816 = vst [vmem:[#allocation2 + $0xa8] sm:$0xff] %v752_v43  ;;  %818 = vst [vmem:[#allocation2 + $0xb8] sm:$0xff] %v754_v44  ;;  %v755_v47 = vadd.f32 %v3993_v53, %v547_v45  ;;  %v757_v48 = vadd.f32 %v3995_v54, %v660_v46 }
 0x14a   : > { %v549_v49 = vpop.f32.mrf.mxu0  ;;  %v662_v50 = vpop.f32.mrf.mxu1 }
 0x14b   : > { %819 = vst [vmem:[#allocation2 + $0xc0] sm:$0xff] %v755_v47  ;;  %821 = vst [vmem:[#allocation2 + $0xd0] sm:$0xff] %v757_v48  ;;  %v756_v51 = vadd.f32 %v3997_v55, %v549_v49  ;;  %v758_v52 = vadd.f32 %v3999_v56, %v662_v50 }
 0x14c   : > { %v551_v57 = vpop.f32.mrf.mxu0  ;;  %v664_v58 = vpop.f32.mrf.mxu1 }
 0x14d   : > { %820 = vst [vmem:[#allocation2 + $0xc8] sm:$0xff] %v756_v51  ;;  %822 = vst [vmem:[#allocation2 + $0xd8] sm:$0xff] %v758_v52  ;;  %v759_v59 = vadd.f32 %v3993_v53, %v551_v57  ;;  %v761_v60 = vadd.f32 %v3995_v54, %v664_v58 }
 0x14e   : > { %v553_v61 = vpop.f32.mrf.mxu0  ;;  %v666_v62 = vpop.f32.mrf.mxu1 }
 0x14f   : > { %823 = vst [vmem:[#allocation2 + $0xe0] sm:$0xff] %v759_v59  ;;  %825 = vst [vmem:[#allocation2 + $0xf0] sm:$0xff] %v761_v60  ;;  %v760_v63 = vadd.f32 %v3997_v55, %v553_v61  ;;  %v762_v1 = vadd.f32 %v3999_v56, %v666_v62 }
 0x150   : > { %v557_v2 = vpop.f32.mrf.mxu0  ;;  %v670_v3 = vpop.f32.mrf.mxu1 }
 0x151   : > { %824 = vst [vmem:[#allocation2 + $0xe8] sm:$0xff] %v760_v63  ;;  %826 = vst [vmem:[#allocation2 + $0xf8] sm:$0xff] %v762_v1  ;;  %v763_v4 = vadd.f32 %v3993_v53, %v557_v2  ;;  %v765_v5 = vadd.f32 %v3995_v54, %v670_v3 }
 0x152   : > { %v559_v6 = vpop.f32.mrf.mxu0  ;;  %v672_v13 = vpop.f32.mrf.mxu1 }
 0x153   : > { %827 = vst [vmem:[#allocation2 + $0x100] sm:$0xff] %v763_v4  ;;  %829 = vst [vmem:[#allocation2 + $0x110] sm:$0xff] %v765_v5  ;;  %v764_v22 = vadd.f32 %v3997_v55, %v559_v6  ;;  %v766_v31 = vadd.f32 %v3999_v56, %v672_v13 }
 0x154   : > { %v561_v39 = vpop.f32.mrf.mxu0  ;;  %v674_v42 = vpop.f32.mrf.mxu1 }
 0x155   : > { %828 = vst [vmem:[#allocation2 + $0x108] sm:$0xff] %v764_v22  ;;  %830 = vst [vmem:[#allocation2 + $0x118] sm:$0xff] %v766_v31  ;;  %v767_v43 = vadd.f32 %v3993_v53, %v561_v39  ;;  %v769_v44 = vadd.f32 %v3995_v54, %v674_v42 }
 0x156   : > { %v563_v45 = vpop.f32.mrf.mxu0  ;;  %v676_v46 = vpop.f32.mrf.mxu1 }
 0x157   : > { %831 = vst [vmem:[#allocation2 + $0x120] sm:$0xff] %v767_v43  ;;  %833 = vst [vmem:[#allocation2 + $0x130] sm:$0xff] %v769_v44  ;;  %v768_v47 = vadd.f32 %v3997_v55, %v563_v45  ;;  %v770_v48 = vadd.f32 %v3999_v56, %v676_v46 }
 0x158   : > { %v567_v49 = vpop.f32.mrf.mxu0  ;;  %v680_v50 = vpop.f32.mrf.mxu1 }
 0x159   : > { %832 = vst [vmem:[#allocation2 + $0x128] sm:$0xff] %v768_v47  ;;  %834 = vst [vmem:[#allocation2 + $0x138] sm:$0xff] %v770_v48  ;;  %v771_v51 = vadd.f32 %v3993_v53, %v567_v49  ;;  %v773_v52 = vadd.f32 %v3995_v54, %v680_v50 }
 0x15a   : > { %v569_v57 = vpop.f32.mrf.mxu0  ;;  %v682_v58 = vpop.f32.mrf.mxu1 }
 0x15b   : > { %835 = vst [vmem:[#allocation2 + $0x140] sm:$0xff] %v771_v51  ;;  %837 = vst [vmem:[#allocation2 + $0x150] sm:$0xff] %v773_v52  ;;  %v772_v59 = vadd.f32 %v3997_v55, %v569_v57  ;;  %v774_v60 = vadd.f32 %v3999_v56, %v682_v58 }
 0x15c   : > { %v571_v61 = vpop.f32.mrf.mxu0  ;;  %v684_v62 = vpop.f32.mrf.mxu1 }
 0x15d   : > { %836 = vst [vmem:[#allocation2 + $0x148] sm:$0xff] %v772_v59  ;;  %838 = vst [vmem:[#allocation2 + $0x158] sm:$0xff] %v774_v60  ;;  %v775_v63 = vadd.f32 %v3993_v53, %v571_v61  ;;  %v777_v1 = vadd.f32 %v3995_v54, %v684_v62 }
 0x15e   : > { %v573_v2 = vpop.f32.mrf.mxu0  ;;  %v686_v3 = vpop.f32.mrf.mxu1 }
 0x15f   : > { %839 = vst [vmem:[#allocation2 + $0x160] sm:$0xff] %v775_v63  ;;  %841 = vst [vmem:[#allocation2 + $0x170] sm:$0xff] %v777_v1  ;;  %v776_v4 = vadd.f32 %v3997_v55, %v573_v2  ;;  %v778_v5 = vadd.f32 %v3999_v56, %v686_v3 }
 0x160   : > { %v577_v6 = vpop.f32.mrf.mxu0  ;;  %v690_v13 = vpop.f32.mrf.mxu1 }
 0x161   : > { %840 = vst [vmem:[#allocation2 + $0x168] sm:$0xff] %v776_v4  ;;  %842 = vst [vmem:[#allocation2 + $0x178] sm:$0xff] %v778_v5  ;;  %v779_v22 = vadd.f32 %v3993_v53, %v577_v6  ;;  %v781_v31 = vadd.f32 %v3995_v54, %v690_v13 }
 0x162   : > { %v579_v39 = vpop.f32.mrf.mxu0  ;;  %v692_v42 = vpop.f32.mrf.mxu1 }
 0x163   : > { %843 = vst [vmem:[#allocation2 + $0x180] sm:$0xff] %v779_v22  ;;  %845 = vst [vmem:[#allocation2 + $0x190] sm:$0xff] %v781_v31  ;;  %v780_v43 = vadd.f32 %v3997_v55, %v579_v39  ;;  %v782_v44 = vadd.f32 %v3999_v56, %v692_v42 }
 0x164   : > { %v581_v45 = vpop.f32.mrf.mxu0  ;;  %v694_v46 = vpop.f32.mrf.mxu1 }
 0x165   : > { %844 = vst [vmem:[#allocation2 + $0x188] sm:$0xff] %v780_v43  ;;  %846 = vst [vmem:[#allocation2 + $0x198] sm:$0xff] %v782_v44  ;;  %v783_v47 = vadd.f32 %v3993_v53, %v581_v45  ;;  %v785_v48 = vadd.f32 %v3995_v54, %v694_v46 }
 0x166   : > { %v583_v49 = vpop.f32.mrf.mxu0  ;;  %v696_v50 = vpop.f32.mrf.mxu1 }
 0x167   : > { %847 = vst [vmem:[#allocation2 + $0x1a0] sm:$0xff] %v783_v47  ;;  %849 = vst [vmem:[#allocation2 + $0x1b0] sm:$0xff] %v785_v48  ;;  %v784_v51 = vadd.f32 %v3997_v55, %v583_v49  ;;  %v786_v52 = vadd.f32 %v3999_v56, %v696_v50 }
 0x168   : > { %v587_v57 = vpop.f32.mrf.mxu0  ;;  %v700_v58 = vpop.f32.mrf.mxu1 }
 0x169   : > { %848 = vst [vmem:[#allocation2 + $0x1a8] sm:$0xff] %v784_v51  ;;  %850 = vst [vmem:[#allocation2 + $0x1b8] sm:$0xff] %v786_v52  ;;  %v787_v59 = vadd.f32 %v3993_v53, %v587_v57  ;;  %v789_v60 = vadd.f32 %v3995_v54, %v700_v58 }
 0x16a   : > { %v589_v61 = vpop.f32.mrf.mxu0  ;;  %v702_v62 = vpop.f32.mrf.mxu1 }
 0x16b   : > { %851 = vst [vmem:[#allocation2 + $0x1c0] sm:$0xff] %v787_v59  ;;  %853 = vst [vmem:[#allocation2 + $0x1d0] sm:$0xff] %v789_v60  ;;  %v788_v63 = vadd.f32 %v3997_v55, %v589_v61  ;;  %v790_v1 = vadd.f32 %v3999_v56, %v702_v62 }
 0x16c   : > { %v591_v2 = vpop.f32.mrf.mxu0  ;;  %v704_v3 = vpop.f32.mrf.mxu1 }
 0x16d   : > { %852 = vst [vmem:[#allocation2 + $0x1c8] sm:$0xff] %v788_v63  ;;  %854 = vst [vmem:[#allocation2 + $0x1d8] sm:$0xff] %v790_v1  ;;  %v791_v4 = vadd.f32 %v3993_v53, %v591_v2  ;;  %v793_v5 = vadd.f32 %v3995_v54, %v704_v3 }
 0x16e   : > { %v593_v6 = vpop.f32.mrf.mxu0  ;;  %v706_v13 = vpop.f32.mrf.mxu1 }
 0x16f   : > { %855 = vst [vmem:[#allocation2 + $0x1e0] sm:$0xff] %v791_v4  ;;  %857 = vst [vmem:[#allocation2 + $0x1f0] sm:$0xff] %v793_v5  ;;  %v792_v22 = vadd.f32 %v3997_v55, %v593_v6  ;;  %v794_v31 = vadd.f32 %v3999_v56, %v706_v13 }
 0x170   : > { %v1104_v39 = vpop.f32.mrf.mxu0  ;;  %v1147_v43 = vpop.f32.mrf.mxu1 }
 0x171   : > { %856 = vst [vmem:[#allocation2 + $0x1e8] sm:$0xff] %v792_v22  ;;  %858 = vst [vmem:[#allocation2 + $0x1f8] sm:$0xff] %v794_v31 }
 0x172   : > { %v1106_v42 = vpop.f32.mrf.mxu0  ;;  %v1149_v48 = vpop.f32.mrf.mxu1 }
 0x174   : > { %v1108_v44 = vpop.f32.mrf.mxu0  ;;  %v1151_v59 = vpop.f32.mrf.mxu1 }
 0x176   : > { %v1110_v50 = vpop.f32.mrf.mxu0  ;;  %v1153_v62 = vpop.f32.mrf.mxu1 }
 0x178   : > { %v901_v45 = vld [vmem:[%s900_s9] sm:$0xff]  ;;  %v902_v53 = vld [vmem:[%s900_s9 + $0x8] sm:$0xff]  ;;  %v904_v60 = vld [vmem:[%s900_s9 + $0x18] sm:$0xff] }
 0x179   : > { %v1156_v46 = vadd.f32 %v1104_v39, %v901_v45  ;;  %v1157_v54 = vadd.f32 %v1106_v42, %v902_v53  ;;  %v905_v47 = vld [vmem:[%s900_s9 + $0x20] sm:$0xff]  ;;  %v906_v49 = vld [vmem:[%s900_s9 + $0x28] sm:$0xff]  ;;  %v908_v61 = vld [vmem:[%s900_s9 + $0x38] sm:$0xff]  ;;  %v1159_v1 = vadd.f32 %v1149_v48, %v904_v60 }
 0x17a   : > { %v1160_v51 = vadd.f32 %v1108_v44, %v905_v47  ;;  %v1161_v55 = vadd.f32 %v1110_v50, %v906_v49  ;;  %v903_v63 = vld [vmem:[%s900_s9 + $0x10] sm:$0xff]  ;;  %v1163_v3 = vadd.f32 %v1153_v62, %v908_v61 }
 0x17b   : > { %v2732_v52 = vmul.f32 -1.442695, %v1156_v46  ;;  %v2733_v56 = vmul.f32 -1.442695, %v1157_v54  ;;  %v907_v2 = vld [vmem:[%s900_s9 + $0x30] sm:$0xff]  ;;  %v1158_v4 = vadd.f32 %v1147_v43, %v903_v63  ;;  %s2851_s9 = sshll.u32 %s3987_s11, 3 }
 0x17c   : > { %v2734_v57 = vmul.f32 -1.442695, %v1160_v51  ;;  %v2735_v58 = vmul.f32 -1.442695, %v1161_v55  ;;  %v2736_v5 = vmul.f32 -1.442695, %v1159_v1  ;;  %v1162_v6 = vadd.f32 %v1151_v59, %v907_v2  ;;  %s1725_s1 = scalar_lea.vmem %s4074_s23, %s2851_s9 [#allocation13] }
 0x17d   : > { %3061 = vpow2.f32 %v2732_v52  ;;  %v2737_v13 = vmul.f32 -1.442695, %v1163_v3 }
 0x17e   : > { %3063 = vpow2.f32 %v2733_v56 }
 0x17f   : > { %3065 = vpow2.f32 %v2734_v57 }
 0x180   : > { %3067 = vpow2.f32 %v2735_v58 }
 0x181   : > { %3069 = vtanh.f32 %v1158_v4 }
 0x182   : > { %3071 = vpow2.f32 %v2736_v5 }
 0x183   : > { %3073 = vtanh.f32 %v1162_v6 }
 0x184   : > { %3075 = vpow2.f32 %v2737_v13 }
 0x18a   : > { %v3062_v22 = vpop.eup %3061 }
 0x18b   : > { %v3064_v31 = vpop.eup %3063  ;;  %v1176_v39 = vadd.f32 1.0, %v3062_v22 }
 0x18c   : > { %v3066_v42 = vpop.eup %3065  ;;  %v1177_v44 = vadd.f32 1.0, %v3064_v31  ;;  %v1235_v31 = vld [vmem:[%s4119_s26 + $0x30] sm:$0xff] }
 0x18d   : > { %3077 = vrcp.f32 %v1176_v39  ;;  %v1178_v45 = vadd.f32 1.0, %v3066_v42  ;;  %v3068_v53 = vpop.eup %3067 }
 0x18e   : > { %3079 = vrcp.f32 %v1177_v44  ;;  %v1179_v46 = vadd.f32 1.0, %v3068_v53  ;;  %v3070_v43 = vpop.eup %3069 }
 0x18f   : > { %3081 = vrcp.f32 %v1178_v45  ;;  %v3072_v54 = vpop.eup %3071 }
 0x190   : > { %3083 = vrcp.f32 %v1179_v46  ;;  %v3074_v47 = vpop.eup %3073  ;;  %v1196_v56 = vadd.f32 1.0, %v3072_v54 }
 0x191   : > { %v3076_v48 = vpop.eup %3075 }
 0x192   : > { %v1197_v60 = vadd.f32 1.0, %v3076_v48 }
 0x19a   : > { %v3078_v49 = vpop.eup %3077 }
 0x19b   : > { %v3080_v50 = vpop.eup %3079  ;;  %v1204_v51 = vmul.f32 %v3078_v49, %v3070_v43 }
 0x19c   : > { %v3082_v55 = vpop.eup %3081  ;;  %v1202_v52 = vmul.f32 0.0, %v3080_v50 }
 0x19d   : > { %v1205_v57 = vmul.f32 %v3082_v55, %v3074_v47  ;;  %v3084_v58 = vpop.eup %3083 }
 0x19e   : > { %v4066_v59 = vadd.f32 %v1204_v51, %v1202_v52  ;;  %v1203_v61 = vmul.f32 0.0, %v3084_v58 }
 0x1a0   : > { %3085 = vtanh.f32 %v4066_v59  ;;  %v4069_v62 = vadd.f32 %v1205_v57, %v1203_v61 }
 0x1a1   : > { %3087 = vrcp.f32 %v1196_v56 }
 0x1a2   : > { %3089 = vrcp.f32 %v1197_v60 }
 0x1a3   : > { %3091 = vtanh.f32 %v4069_v62 }
 0x1ad   : > { %v3086_v63 = vpop.eup %3085 }
 0x1ae   : > { %v3088_v1 = vpop.eup %3087 }
 0x1af   : > { %v3090_v2 = vpop.eup %3089  ;;  %v1210_v3 = vmul.f32 %v3088_v1, %v3086_v63 }
 0x1b0   : > { %v3092_v4 = vpop.eup %3091 }
 0x1b1   : > { %v1211_v5 = vmul.f32 %v3092_v4, %v3090_v2 }
 0x1b3   : > { %v1212_v6 = vpack.c.bf16 %v1211_v5, %v1210_v3 }
 0x1b5   : > { %2872 = vst [vmem:[%s1222_s27] sm:$0xff] %v1212_v6   ;;  %1270 = vmatmul.mubr.bf16.vlgmr.msra.gmra.mxu0 %v1212_v6  ;;  %1313 = vmatmul.mubr.bf16.vlgmr.msra.gmra.mxu1 %v1212_v6  ;;  %v4140_v6 = vld [vmem:[%s3755_s17 + $0xe0] ss:$16 sps:$4 sm:$0xff]   ;;  %s2855_s27 = sshll.u32 %s3990_s24, 3 }
 0x1b6   : > { %1406 = vmatpush1.bf16.msra.mxu0 %v3770_v7  ;;  %1449 = vmatpush1.bf16.msra.mxu1 %v3792_v12  ;;  %v4110_v7 = vld [vmem:[%s3755_s17 + $0xe4] ss:$16 sps:$4 sm:$0xff]   ;;  %s1893_s5 = scalar_lea.vmem %s4074_s23, %s2855_s27 [#allocation13] }
 0x1b7   : > { %1407 = vmatprep.subr.bf16.mxu0 %v3774_v8  ;;  %1450 = vmatprep.subr.bf16.mxu1 %v3805_v16  ;;  %v1229_v8 = vld [vmem:[%s4119_s26] sm:$0xff] }
 0x1b8   : > { %1437 = vmatprep.mubr.bf16.mxu0 %v3557_v0  ;;  %1480 = vmatprep.mubr.bf16.mxu1 %v3557_v0 }
 0x1ba   : > { %1408 = vmatpush1.bf16.msra.mxu0 %v3781_v9  ;;  %1451 = vmatpush1.bf16.msra.mxu1 %v3808_v17 }
 0x1bb   : > { %1409 = vmatprep.subr.bf16.mxu0 %v3786_v10  ;;  %1452 = vmatprep.subr.bf16.mxu1 %v3823_v20 }
 0x1be   : > { %1410 = vmatpush1.bf16.msra.mxu0 %v3796_v14  ;;  %1453 = vmatpush1.bf16.msra.mxu1 %v3828_v21  ;;  %v1230_v14 = vld [vmem:[%s4119_s26 + $0x8] sm:$0xff] }
 0x1bf   : > { %1411 = vmatprep.subr.bf16.mxu0 %v3802_v15  ;;  %1454 = vmatprep.subr.bf16.mxu1 %v3839_v25 }
 0x1c2   : > { %1412 = vmatpush1.bf16.msra.mxu0 %v3815_v18  ;;  %1455 = vmatpush1.bf16.msra.mxu1 %v3844_v26 }
 0x1c3   : > { %1413 = vmatprep.subr.bf16.mxu0 %v3818_v19  ;;  %1456 = vmatprep.subr.bf16.mxu1 %v3856_v28 }
 0x1c6   : > { %1414 = vmatpush1.bf16.msra.mxu0 %v3832_v23  ;;  %1457 = vmatpush1.bf16.msra.mxu1 %v3864_v30  ;;  %v1234_v23 = vld [vmem:[%s4119_s26 + $0x28] sm:$0xff] }
 0x1c7   : > { %1415 = vmatprep.subr.bf16.mxu0 %v3836_v24  ;;  %1458 = vmatprep.subr.bf16.mxu1 %v3872_v33  ;;  %v1231_v33 = vld [vmem:[%s4119_s26 + $0x10] sm:$0xff] }
 0x1ca   : > { %1416 = vmatpush1.bf16.msra.mxu0 %v3852_v27  ;;  %1459 = vmatpush1.bf16.msra.mxu1 %v3877_v34  ;;  %v1236_v34 = vld [vmem:[%s4119_s26 + $0x38] sm:$0xff] }
 0x1cb   : > { %1417 = vmatprep.subr.bf16.mxu0 %v3861_v29  ;;  %1460 = vmatprep.subr.bf16.mxu1 %v3885_v36  ;;  %v1232_v29 = vld [vmem:[%s4119_s26 + $0x18] sm:$0xff] }
 0x1ce   : > { %1418 = vmatpush1.bf16.msra.mxu0 %v3868_v32  ;;  %1461 = vmatpush1.bf16.msra.mxu1 %v3897_v38 }
 0x1cf   : > { %1419 = vmatprep.subr.bf16.mxu0 %v3880_v35  ;;  %1462 = vmatprep.subr.bf16.mxu1 %v3902_v40 }
 0x1d2   : > { %1420 = vmatpush1.bf16.msra.mxu0 %v3892_v37  ;;  %1463 = vmatpush1.bf16.msra.mxu1 %v3906_v41 }
 0x1d3   : > { %1573 = vmatprep.subr.bf16.mxu0 %v4110_v7  ;;  %1616 = vmatprep.subr.bf16.mxu1 %v3789_v11  ;;  %v1233_v11 = vld [vmem:[%s4119_s26 + $0x20] sm:$0xff]  ;;  %s2859_s26 = sshll.u32 %s3971_s12, 3 }
 0x1d4   : > { %s2061_s20 = scalar_lea.vmem %s4074_s23, %s2859_s26 [#allocation13] }
 0x275   : > { %v1271_v9 = vpop.f32.mrf.mxu0  ;;  %v1314_v12 = vpop.f32.mrf.mxu1 }
 0x276   : > { %v1323_v10 = vadd.f32 %v1271_v9, %v1229_v8  ;;  %v1325_v35 = vadd.f32 %v1314_v12, %v1231_v33  ;;  %v4144_v8 = vld [vmem:[%s3755_s17 + $0xe8] ss:$16 sps:$4 sm:$0xff]   ;;  %v4148_v9 = vld [vmem:[%s3755_s17 + $0xc4] ss:$16 sps:$4 sm:$0xff]   ;;  %v4158_v12 = vld [vmem:[%s3755_s17 + $0xc0] ss:$16 sps:$4 sm:$0xff]  }
 0x277   : > { %v1273_v15 = vpop.f32.mrf.mxu0  ;;  %v1316_v20 = vpop.f32.mrf.mxu1  ;;  %v4234_v33 = vld [vmem:[%s3755_s17 + $0x2c] ss:$16 sps:$4 sm:$0xff]  }
 0x278   : > { %v2744_v16 = vmul.f32 -1.442695, %v1323_v10  ;;  %v1324_v17 = vadd.f32 %v1273_v15, %v1230_v14  ;;  %v1326_v32 = vadd.f32 %v1316_v20, %v1232_v29  ;;  %v4152_v10 = vld [vmem:[%s3755_s17 + $0xcc] ss:$16 sps:$4 sm:$0xff]   ;;  %v4162_v14 = vld [vmem:[%s3755_s17 + $0xc8] ss:$16 sps:$4 sm:$0xff]  }
 0x279   : > { %v1275_v18 = vpop.f32.mrf.mxu0  ;;  %v1318_v27 = vpop.f32.mrf.mxu1  ;;  %v4166_v15 = vld [vmem:[%s3755_s17 + $0xa4] ss:$16 sps:$4 sm:$0xff]   ;;  %v4190_v20 = vld [vmem:[%s3755_s17 + $0x80] ss:$16 sps:$4 sm:$0xff]  }
 0x27a   : > { %3093 = vpow2.f32 %v2744_v16  ;;  %v2745_v19 = vmul.f32 -1.442695, %v1324_v17  ;;  %v1327_v21 = vadd.f32 %v1275_v18, %v1233_v11  ;;  %v2748_v38 = vmul.f32 -1.442695, %v1326_v32  ;;  %v4170_v16 = vld [vmem:[%s3755_s17 + $0xac] ss:$16 sps:$4 sm:$0xff]  }
 0x27b   : > { %v1277_v24 = vpop.f32.mrf.mxu0  ;;  %v1320_v30 = vpop.f32.mrf.mxu1  ;;  %v1329_v42 = vadd.f32 %v1318_v27, %v1235_v31  ;;  %v4174_v17 = vld [vmem:[%s3755_s17 + $0xa0] ss:$16 sps:$4 sm:$0xff]   ;;  %v4178_v11 = vld [vmem:[%s3755_s17 + $0xa8] ss:$16 sps:$4 sm:$0xff]   ;;  %v4182_v18 = vld [vmem:[%s3755_s17 + $0x84] ss:$16 sps:$4 sm:$0xff]  }
 0x27c   : > { %3095 = vpow2.f32 %v2745_v19  ;;  %v2746_v25 = vmul.f32 -1.442695, %v1327_v21  ;;  %v1328_v26 = vadd.f32 %v1277_v24, %v1234_v23  ;;  %v1330_v36 = vadd.f32 %v1320_v30, %v1236_v34  ;;  %v4186_v19 = vld [vmem:[%s3755_s17 + $0x8c] ss:$16 sps:$4 sm:$0xff]   ;;  %v4194_v21 = vld [vmem:[%s3755_s17 + $0x88] ss:$16 sps:$4 sm:$0xff]  }
 0x27d   : > { %v4198_v23 = vld [vmem:[%s3755_s17 + $0x64] ss:$16 sps:$4 sm:$0xff]   ;;  %v4202_v24 = vld [vmem:[%s3755_s17 + $0x6c] ss:$16 sps:$4 sm:$0xff]   ;;  %v4222_v29 = vld [vmem:[%s3755_s17 + $0x40] ss:$16 sps:$4 sm:$0xff]  }
 0x27e   : > { %3097 = vpow2.f32 %v2746_v25  ;;  %v2747_v28 = vmul.f32 -1.442695, %v1328_v26  ;;  %v2749_v13 = vmul.f32 -1.442695, %v1330_v36  ;;  %v4206_v25 = vld [vmem:[%s3755_s17 + $0x60] ss:$16 sps:$4 sm:$0xff]  }
 0x27f   : > { %v4210_v26 = vld [vmem:[%s3755_s17 + $0x68] ss:$16 sps:$4 sm:$0xff]   ;;  %v4214_v27 = vld [vmem:[%s3755_s17 + $0x44] ss:$16 sps:$4 sm:$0xff]   ;;  %v4238_v34 = vld [vmem:[%s3755_s17 + $0x20] ss:$16 sps:$4 sm:$0xff]  }
 0x280   : > { %3099 = vpow2.f32 %v2747_v28  ;;  %v4218_v28 = vld [vmem:[%s3755_s17 + $0x4c] ss:$16 sps:$4 sm:$0xff]   ;;  %v4226_v30 = vld [vmem:[%s3755_s17 + $0x48] ss:$16 sps:$4 sm:$0xff]   ;;  %v4230_v32 = vld [vmem:[%s3755_s17 + $0x24] ss:$16 sps:$4 sm:$0xff]  }
 0x281   : > { %3101 = vtanh.f32 %v1325_v35  ;;  %v4242_v35 = vld [vmem:[%s3755_s17 + $0x28] ss:$16 sps:$4 sm:$0xff]   ;;  %v4246_v36 = vld [vmem:[%s3755_s17 + $0x4] ss:$16 sps:$4 sm:$0xff]  }
 0x287   : > { %v3094_v37 = vpop.eup %3093 }
 0x288   : > { %v1343_v40 = vadd.f32 1.0, %v3094_v37  ;;  %v4250_v37 = vld [vmem:[%s3755_s17 + $0xc] ss:$16 sps:$4 sm:$0xff]  }
 0x289   : > { %v3096_v41 = vpop.eup %3095 }
 0x28a   : > { %3103 = vrcp.f32 %v1343_v40  ;;  %v1344_v22 = vadd.f32 1.0, %v3096_v41  ;;  %v4258_v40 = vld [vmem:[%s3755_s17 + $0x8] ss:$16 sps:$4 sm:$0xff]   ;;  %v4263_v41 = vld [vmem:[%s3755_s17 + $0xec] ss:$16 sps:$4 sm:$0xff]  }
 0x28b   : > { %v3098_v39 = vpop.eup %3097  ;;  %3105 = vpow2.f32 %v2748_v38  ;;  %v4254_v38 = vld [vmem:[%s3755_s17] ss:$16 sps:$4 sm:$0xff]   ;;  %s2847_s17 = sshll.u32 %s3982_s13, 3  ;;  %s2848_s13 = sshll.u32 %s3987_s11, 6 }
 0x28c   : > { %3107 = vrcp.f32 %v1344_v22  ;;  %v1345_v44 = vadd.f32 1.0, %v3098_v39  ;;  %s1557_s6 = scalar_lea.vmem %s4074_s23, %s2847_s17 [#allocation13]  ;;  %s4322_s14 = scalar_lea.vmem [#allocation2], %s2848_s13 }
 0x28d   : > { %v3100_v45 = vpop.eup %3099  ;;  %3109 = vpow2.f32 %v2749_v13  ;;  %v1397_v13 = vld [vmem:[%s4267_s29] sm:$0xff]  ;;  %s2852_s11 = sshll.u32 %s3990_s24, 6  ;;  %s2856_s24 = sshll.u32 %s3971_s12, 6 }
 0x28e   : > { %3111 = vrcp.f32 %v1345_v44  ;;  %v1346_v53 = vadd.f32 1.0, %v3100_v45  ;;  %v3102_v46 = vpop.eup %3101  ;;  %s4377_s21 = scalar_lea.vmem [#allocation2], %s2852_s11  ;;  %s4432_s30 = scalar_lea.vmem [#allocation2], %s2856_s24 }
 0x28f   : > { %3113 = vtanh.f32 %v1329_v42  ;;  %v1398_v42 = vld [vmem:[%s4267_s29 + $0x8] sm:$0xff]  ;;  %s2860_s12 = sshll.u32 %s3975_s25, 6  ;;  %s2864_s17 = sshll.u32 %s3978_s7, 6 }
 0x290   : > { %3115 = vrcp.f32 %v1346_v53  ;;  %s2867_s25 = sshll.u32 %s3978_s7, 3  ;;  %s2423_s13 = sshll.u32 %s4074_s23, 4  ;;  %s4522_s13 = int_to_ptr.vmem [resolvable:$true] %s2423_s13 }
 0x291   : > { %s2397_s9 = scalar_lea.vmem %s4074_s23, %s2867_s25 [#allocation13]  ;;  %s2405_s7 = scalar_lea.sflag [#allocation7], %s3746_s22 }
 0x292   : > { %s3459_s27 = scalar_lea.vmem %s4522_s13, 1024 }
 0x293   : > { %p3460_p8 = scmp.ne.s32.totalorder %s4522_s13, %s3459_s27 }
 0x295   : > { %p3461_p7 = pnand %p3460_p8, %p4612_p0 }
 0x297   : > { %v3104_v43 = vpop.eup %3103  ;;  %p3462_p10 = pneg %p3461_p7 }
 0x298   : > { %v3106_v54 = vpop.eup %3105  ;;  %v1371_v49 = vmul.f32 %v3104_v43, %v3102_v46  ;;  %v1401_v46 = vld [vmem:[%s4267_s29 + $0x20] sm:$0xff] }
 0x299   : > { %v3108_v47 = vpop.eup %3107  ;;  %v1363_v55 = vadd.f32 1.0, %v3106_v54 }
 0x29a   : > { %v3110_v48 = vpop.eup %3109  ;;  %v1369_v50 = vmul.f32 %v3108_v47, %v4066_v59 }
 0x29b   : > { %v3112_v51 = vpop.eup %3111  ;;  %v1364_v58 = vadd.f32 1.0, %v3110_v48  ;;  %3117 = vrcp.f32 %v1363_v55 }
 0x29c   : > { %v3114_v52 = vpop.eup %3113  ;;  %v4130_v56 = vadd.f32 %v1371_v49, %v1369_v50  ;;  %v1402_v49 = vld [vmem:[%s4267_s29 + $0x28] sm:$0xff] }
 0x29d   : > { %v3116_v57 = vpop.eup %3115  ;;  %v1372_v60 = vmul.f32 %v3114_v52, %v3112_v51 }
 0x29e   : > { %v1370_v61 = vmul.f32 %v3116_v57, %v4069_v62  ;;  %3119 = vtanh.f32 %v4130_v56 }
 0x29f   : > { %3121 = vrcp.f32 %v1364_v58  ;;  %v1400_v58 = vld [vmem:[%s4267_s29 + $0x18] sm:$0xff] }
 0x2a0   : > { %v4133_v63 = vadd.f32 %v1372_v60, %v1370_v61 }
 0x2a2   : > { %3123 = vtanh.f32 %v4133_v63 }
 0x2a8   : > { %v3118_v59 = vpop.eup %3117 }
 0x2ab   : > { %v3120_v1 = vpop.eup %3119 }
 0x2ac   : > { %v3122_v2 = vpop.eup %3121  ;;  %v1377_v4 = vmul.f32 %v3120_v1, %v3118_v59  ;;  %v1399_v59 = vld [vmem:[%s4267_s29 + $0x10] sm:$0xff]  ;;  %v1404_v1 = vld [vmem:[%s4267_s29 + $0x38] sm:$0xff] }
 0x2af   : > { %v3124_v3 = vpop.eup %3123 }
 0x2b0   : > { %v1378_v5 = vmul.f32 %v3124_v3, %v3122_v2 }
 0x2b2   : > { %v1379_v62 = vpack.c.bf16 %v1378_v5, %v1377_v4 }
 0x2b4   : > { %2877 = vst [vmem:[%s1389_s8] sm:$0xff] %v1379_v62   ;;  %1438 = vmatmul.mubr.bf16.vlgmr.msra.gmra.mxu0 %v1379_v62  ;;  %1481 = vmatmul.mubr.bf16.vlgmr.msra.gmra.mxu1 %v1379_v62  ;;  %s4485_s8 = scalar_lea.vmem [#allocation2], %s2860_s12 }
 0x2b5   : > { %1574 = vmatpush1.bf16.msra.mxu0 %v4140_v6  ;;  %1617 = vmatpush1.bf16.msra.mxu1 %v4144_v8 }
 0x2b6   : > { %1575 = vmatprep.subr.bf16.mxu0 %v4148_v9  ;;  %1618 = vmatprep.subr.bf16.mxu1 %v4152_v10 }
 0x2b7   : > { %1605 = vmatprep.mubr.bf16.mxu0 %v3557_v0  ;;  %1648 = vmatprep.mubr.bf16.mxu1 %v3557_v0 }
 0x2b9   : > { %1576 = vmatpush1.bf16.msra.mxu0 %v4158_v12  ;;  %1619 = vmatpush1.bf16.msra.mxu1 %v4162_v14 }
 0x2ba   : > { %1577 = vmatprep.subr.bf16.mxu0 %v4166_v15  ;;  %1620 = vmatprep.subr.bf16.mxu1 %v4170_v16 }
 0x2bd   : > { %1578 = vmatpush1.bf16.msra.mxu0 %v4174_v17  ;;  %1621 = vmatpush1.bf16.msra.mxu1 %v4178_v11 }
 0x2be   : > { %1579 = vmatprep.subr.bf16.mxu0 %v4182_v18  ;;  %1622 = vmatprep.subr.bf16.mxu1 %v4186_v19 }
 0x2c1   : > { %1580 = vmatpush1.bf16.msra.mxu0 %v4190_v20  ;;  %1623 = vmatpush1.bf16.msra.mxu1 %v4194_v21 }
 0x2c2   : > { %1581 = vmatprep.subr.bf16.mxu0 %v4198_v23  ;;  %1624 = vmatprep.subr.bf16.mxu1 %v4202_v24 }
 0x2c5   : > { %1582 = vmatpush1.bf16.msra.mxu0 %v4206_v25  ;;  %1625 = vmatpush1.bf16.msra.mxu1 %v4210_v26 }
 0x2c6   : > { %1583 = vmatprep.subr.bf16.mxu0 %v4214_v27  ;;  %1626 = vmatprep.subr.bf16.mxu1 %v4218_v28 }
 0x2c9   : > { %1584 = vmatpush1.bf16.msra.mxu0 %v4222_v29  ;;  %1627 = vmatpush1.bf16.msra.mxu1 %v4226_v30 }
 0x2ca   : > { %1585 = vmatprep.subr.bf16.mxu0 %v4230_v32  ;;  %1628 = vmatprep.subr.bf16.mxu1 %v4234_v33 }
 0x2cd   : > { %1586 = vmatpush1.bf16.msra.mxu0 %v4238_v34  ;;  %1629 = vmatpush1.bf16.msra.mxu1 %v4242_v35 }
 0x2ce   : > { %1587 = vmatprep.subr.bf16.mxu0 %v4246_v36  ;;  %1630 = vmatprep.subr.bf16.mxu1 %v4250_v37 }
 0x2d1   : > { %1588 = vmatpush1.bf16.msra.mxu0 %v4254_v38  ;;  %1631 = vmatpush1.bf16.msra.mxu1 %v4258_v40 }
 0x2d2   : > { %1741 = vmatprep.subr.bf16.mxu0 %v4110_v7  ;;  %1784 = vmatprep.subr.bf16.mxu1 %v4263_v41 }
 0x374   : > { %v1439_v22 = vpop.f32.mrf.mxu0  ;;  %v1482_v39 = vpop.f32.mrf.mxu1 }
 0x375   : > { %v1491_v31 = vadd.f32 %v1439_v22, %v1397_v13  ;;  %v1493_v2 = vadd.f32 %v1482_v39, %v1399_v59 }
 0x376   : > { %v1441_v44 = vpop.f32.mrf.mxu0  ;;  %v1484_v47 = vpop.f32.mrf.mxu1 }
 0x377   : > { %v2757_v45 = vmul.f32 -1.442695, %v1491_v31  ;;  %v1492_v53 = vadd.f32 %v1441_v44, %v1398_v42  ;;  %v1494_v61 = vadd.f32 %v1484_v47, %v1400_v58  ;;  %v1403_v42 = vld [vmem:[%s4267_s29 + $0x30] sm:$0xff]  ;;  %s2229_s29 = scalar_lea.vmem %s4074_s23, %s2863_s10 [#allocation13] }
 0x378   : > { %v1443_v43 = vpop.f32.mrf.mxu0  ;;  %v1486_v52 = vpop.f32.mrf.mxu1 }
 0x379   : > { %3125 = vpow2.f32 %v2757_v45  ;;  %v2758_v54 = vmul.f32 -1.442695, %v1492_v53  ;;  %v1495_v48 = vadd.f32 %v1443_v43, %v1401_v46  ;;  %v2761_v5 = vmul.f32 -1.442695, %v1494_v61 }
 0x37a   : > { %v1445_v50 = vpop.f32.mrf.mxu0  ;;  %v1488_v60 = vpop.f32.mrf.mxu1  ;;  %v1497_v45 = vadd.f32 %v1486_v52, %v1403_v42 }
 0x37b   : > { %3127 = vpow2.f32 %v2758_v54  ;;  %v2759_v51 = vmul.f32 -1.442695, %v1495_v48  ;;  %v1496_v55 = vadd.f32 %v1445_v50, %v1402_v49  ;;  %v1498_v3 = vadd.f32 %v1488_v60, %v1404_v1 }
 0x37d   : > { %3129 = vpow2.f32 %v2759_v51  ;;  %v2760_v57 = vmul.f32 -1.442695, %v1496_v55  ;;  %v2762_v22 = vmul.f32 -1.442695, %v1498_v3 }
 0x37f   : > { %3131 = vpow2.f32 %v2760_v57 }
 0x380   : > { %3133 = vtanh.f32 %v1493_v2 }
 0x386   : > { %v3126_v4 = vpop.eup %3125 }
 0x387   : > { %v1511_v62 = vadd.f32 1.0, %v3126_v4 }
 0x388   : > { %v3128_v13 = vpop.eup %3127 }
 0x389   : > { %3135 = vrcp.f32 %v1511_v62  ;;  %v1512_v31 = vadd.f32 1.0, %v3128_v13 }
 0x38a   : > { %v3130_v44 = vpop.eup %3129  ;;  %3137 = vpow2.f32 %v2761_v5 }
 0x38b   : > { %3139 = vrcp.f32 %v1512_v31  ;;  %v1513_v53 = vadd.f32 1.0, %v3130_v44 }
 0x38c   : > { %v3132_v46 = vpop.eup %3131  ;;  %3141 = vpow2.f32 %v2762_v22 }
 0x38d   : > { %3143 = vrcp.f32 %v1513_v53  ;;  %v1514_v43 = vadd.f32 1.0, %v3132_v46  ;;  %v3134_v39 = vpop.eup %3133 }
 0x38e   : > { %3145 = vtanh.f32 %v1497_v45  ;;  %v1566_v45 = vld [vmem:[%s4322_s14 + $0x8] sm:$0xff] }
 0x38f   : > { %3147 = vrcp.f32 %v1514_v43 }
 0x396   : > { %v3136_v54 = vpop.eup %3135 }
 0x397   : > { %v3138_v47 = vpop.eup %3137  ;;  %v1539_v50 = vmul.f32 %v3136_v54, %v3134_v39  ;;  %v1569_v39 = vld [vmem:[%s4322_s14 + $0x20] sm:$0xff] }
 0x398   : > { %v3140_v48 = vpop.eup %3139  ;;  %v1531_v57 = vadd.f32 1.0, %v3138_v47 }
 0x399   : > { %v3142_v49 = vpop.eup %3141  ;;  %v1537_v51 = vmul.f32 %v3140_v48, %v4130_v56 }
 0x39a   : > { %v3144_v55 = vpop.eup %3143  ;;  %v1532_v61 = vadd.f32 1.0, %v3142_v49  ;;  %3149 = vrcp.f32 %v1531_v57 }
 0x39b   : > { %v3146_v52 = vpop.eup %3145  ;;  %v4278_v58 = vadd.f32 %v1539_v50, %v1537_v51  ;;  %v1570_v50 = vld [vmem:[%s4322_s14 + $0x28] sm:$0xff] }
 0x39c   : > { %v3148_v60 = vpop.eup %3147  ;;  %v1540_v59 = vmul.f32 %v3146_v52, %v3144_v55 }
 0x39d   : > { %v1538_v1 = vmul.f32 %v3148_v60, %v4133_v63  ;;  %3151 = vtanh.f32 %v4278_v58  ;;  %v1565_v63 = vld [vmem:[%s4322_s14] sm:$0xff] }
 0x39e   : > { %3153 = vrcp.f32 %v1532_v61  ;;  %v1568_v61 = vld [vmem:[%s4322_s14 + $0x18] sm:$0xff] }
 0x39f   : > { %v4281_v2 = vadd.f32 %v1540_v59, %v1538_v1 }
 0x3a1   : > { %3155 = vtanh.f32 %v4281_v2 }
 0x3a7   : > { %v3150_v56 = vpop.eup %3149 }
 0x3aa   : > { %v3152_v3 = vpop.eup %3151 }
 0x3ab   : > { %v3154_v4 = vpop.eup %3153  ;;  %v1545_v62 = vmul.f32 %v3152_v3, %v3150_v56  ;;  %v1567_v56 = vld [vmem:[%s4322_s14 + $0x10] sm:$0xff]  ;;  %v1572_v3 = vld [vmem:[%s4322_s14 + $0x38] sm:$0xff] }
 0x3ae   : > { %v3156_v5 = vpop.eup %3155 }
 0x3af   : > { %v1546_v13 = vmul.f32 %v3156_v5, %v3154_v4 }
 0x3b1   : > { %v1547_v22 = vpack.c.bf16 %v1546_v13, %v1545_v62 }
 0x3b3   : > { %2882 = vst [vmem:[%s1557_s6] sm:$0xff] %v1547_v22   ;;  %1606 = vmatmul.mubr.bf16.vlgmr.msra.gmra.mxu0 %v1547_v22  ;;  %1649 = vmatmul.mubr.bf16.vlgmr.msra.gmra.mxu1 %v1547_v22  ;;  %s4506_s6 = scalar_lea.vmem [#allocation2], %s2864_s17 }
 0x3b4   : > { %1742 = vmatpush1.bf16.msra.mxu0 %v4140_v6  ;;  %1785 = vmatpush1.bf16.msra.mxu1 %v4144_v8 }
 0x3b5   : > { %1743 = vmatprep.subr.bf16.mxu0 %v4148_v9  ;;  %1786 = vmatprep.subr.bf16.mxu1 %v4152_v10 }
 0x3b6   : > { %1773 = vmatprep.mubr.bf16.mxu0 %v3557_v0  ;;  %1816 = vmatprep.mubr.bf16.mxu1 %v3557_v0 }
 0x3b8   : > { %1744 = vmatpush1.bf16.msra.mxu0 %v4158_v12  ;;  %1787 = vmatpush1.bf16.msra.mxu1 %v4162_v14 }
 0x3b9   : > { %1745 = vmatprep.subr.bf16.mxu0 %v4166_v15  ;;  %1788 = vmatprep.subr.bf16.mxu1 %v4170_v16 }
 0x3bc   : > { %1746 = vmatpush1.bf16.msra.mxu0 %v4174_v17  ;;  %1789 = vmatpush1.bf16.msra.mxu1 %v4178_v11 }
 0x3bd   : > { %1747 = vmatprep.subr.bf16.mxu0 %v4182_v18  ;;  %1790 = vmatprep.subr.bf16.mxu1 %v4186_v19 }
 0x3c0   : > { %1748 = vmatpush1.bf16.msra.mxu0 %v4190_v20  ;;  %1791 = vmatpush1.bf16.msra.mxu1 %v4194_v21 }
 0x3c1   : > { %1749 = vmatprep.subr.bf16.mxu0 %v4198_v23  ;;  %1792 = vmatprep.subr.bf16.mxu1 %v4202_v24 }
 0x3c4   : > { %1750 = vmatpush1.bf16.msra.mxu0 %v4206_v25  ;;  %1793 = vmatpush1.bf16.msra.mxu1 %v4210_v26 }
 0x3c5   : > { %1751 = vmatprep.subr.bf16.mxu0 %v4214_v27  ;;  %1794 = vmatprep.subr.bf16.mxu1 %v4218_v28 }
 0x3c8   : > { %1752 = vmatpush1.bf16.msra.mxu0 %v4222_v29  ;;  %1795 = vmatpush1.bf16.msra.mxu1 %v4226_v30 }
 0x3c9   : > { %1753 = vmatprep.subr.bf16.mxu0 %v4230_v32  ;;  %1796 = vmatprep.subr.bf16.mxu1 %v4234_v33 }
 0x3cc   : > { %1754 = vmatpush1.bf16.msra.mxu0 %v4238_v34  ;;  %1797 = vmatpush1.bf16.msra.mxu1 %v4242_v35 }
 0x3cd   : > { %1755 = vmatprep.subr.bf16.mxu0 %v4246_v36  ;;  %1798 = vmatprep.subr.bf16.mxu1 %v4250_v37 }
 0x3d0   : > { %1756 = vmatpush1.bf16.msra.mxu0 %v4254_v38  ;;  %1799 = vmatpush1.bf16.msra.mxu1 %v4258_v40 }
 0x3d1   : > { %1909 = vmatprep.subr.bf16.mxu0 %v4110_v7  ;;  %1952 = vmatprep.subr.bf16.mxu1 %v4263_v41 }
 0x473   : > { %v1607_v31 = vpop.f32.mrf.mxu0  ;;  %v1650_v44 = vpop.f32.mrf.mxu1 }
 0x474   : > { %v1659_v42 = vadd.f32 %v1607_v31, %v1565_v63  ;;  %v1661_v4 = vadd.f32 %v1650_v44, %v1567_v56 }
 0x475   : > { %v1609_v53 = vpop.f32.mrf.mxu0  ;;  %v1652_v48 = vpop.f32.mrf.mxu1 }
 0x476   : > { %v2769_v46 = vmul.f32 -1.442695, %v1659_v42  ;;  %v1660_v43 = vadd.f32 %v1609_v53, %v1566_v45  ;;  %v1662_v1 = vadd.f32 %v1652_v48, %v1568_v61  ;;  %v1571_v45 = vld [vmem:[%s4322_s14 + $0x30] sm:$0xff]  ;;  %s2830_s14 = sshll.u32 %s3539_s18, 6  ;;  %s3559_s18 = smov [#allocation13]  }
 0x477   : > { %v1611_v54 = vpop.f32.mrf.mxu0  ;;  %v1654_v52 = vpop.f32.mrf.mxu1  ;;  %s3463_s23 = sshll.u32 %s3559_s18, 4  ;;  %s3464_s23 = int_to_ptr.vmem [resolvable:$false] %s3463_s23 }
 0x478   : > { %3157 = vpow2.f32 %v2769_v46  ;;  %v2770_v47 = vmul.f32 -1.442695, %v1660_v43  ;;  %v1663_v49 = vadd.f32 %v1611_v54, %v1569_v39  ;;  %v2773_v13 = vmul.f32 -1.442695, %v1662_v1  ;;  %p3466_p4 = scmp.lt.s32.totalorder %s4522_s13, %s3464_s23 }
 0x479   : > { %v1613_v51 = vpop.f32.mrf.mxu0  ;;  %v1656_v59 = vpop.f32.mrf.mxu1  ;;  %v1665_v46 = vadd.f32 %v1654_v52, %v1571_v45 }
 0x47a   : > { %3159 = vpow2.f32 %v2770_v47  ;;  %v2771_v55 = vmul.f32 -1.442695, %v1663_v49  ;;  %v1664_v57 = vadd.f32 %v1613_v51, %v1570_v50  ;;  %v1666_v5 = vadd.f32 %v1656_v59, %v1572_v3 }
 0x47c   : > { %3161 = vpow2.f32 %v2771_v55  ;;  %v2772_v60 = vmul.f32 -1.442695, %v1664_v57  ;;  %v2774_v31 = vmul.f32 -1.442695, %v1666_v5 }
 0x47e   : > { %3163 = vpow2.f32 %v2772_v60 }
 0x47f   : > { %3165 = vtanh.f32 %v1661_v4 }
 0x485   : > { %v3158_v62 = vpop.eup %3157 }
 0x486   : > { %v1679_v22 = vadd.f32 1.0, %v3158_v62 }
 0x487   : > { %v3160_v63 = vpop.eup %3159 }
 0x488   : > { %3167 = vrcp.f32 %v1679_v22  ;;  %v1680_v42 = vadd.f32 1.0, %v3160_v63 }
 0x489   : > { %v3162_v53 = vpop.eup %3161  ;;  %3169 = vpow2.f32 %v2773_v13 }
 0x48a   : > { %3171 = vrcp.f32 %v1680_v42  ;;  %v1681_v43 = vadd.f32 1.0, %v3162_v53 }
 0x48b   : > { %v3164_v39 = vpop.eup %3163  ;;  %3173 = vpow2.f32 %v2774_v31 }
 0x48c   : > { %3175 = vrcp.f32 %v1681_v43  ;;  %v1682_v54 = vadd.f32 1.0, %v3164_v39  ;;  %v3166_v44 = vpop.eup %3165 }
 0x48d   : > { %3177 = vtanh.f32 %v1665_v46  ;;  %v1734_v46 = vld [vmem:[%s4377_s21 + $0x8] sm:$0xff] }
 0x48e   : > { %3179 = vrcp.f32 %v1682_v54 }
 0x495   : > { %v3168_v47 = vpop.eup %3167 }
 0x496   : > { %v3170_v48 = vpop.eup %3169  ;;  %v1707_v51 = vmul.f32 %v3168_v47, %v3166_v44  ;;  %v1737_v44 = vld [vmem:[%s4377_s21 + $0x20] sm:$0xff] }
 0x497   : > { %v3172_v49 = vpop.eup %3171  ;;  %v1699_v60 = vadd.f32 1.0, %v3170_v48 }
 0x498   : > { %v3174_v50 = vpop.eup %3173  ;;  %v1705_v55 = vmul.f32 %v3172_v49, %v4278_v58 }
 0x499   : > { %v3176_v57 = vpop.eup %3175  ;;  %v1700_v1 = vadd.f32 1.0, %v3174_v50  ;;  %3181 = vrcp.f32 %v1699_v60 }
 0x49a   : > { %v3178_v52 = vpop.eup %3177  ;;  %v4333_v61 = vadd.f32 %v1707_v51, %v1705_v55  ;;  %v1738_v51 = vld [vmem:[%s4377_s21 + $0x28] sm:$0xff] }
 0x49b   : > { %v3180_v59 = vpop.eup %3179  ;;  %v1708_v56 = vmul.f32 %v3178_v52, %v3176_v57 }
 0x49c   : > { %v1706_v3 = vmul.f32 %v3180_v59, %v4281_v2  ;;  %3183 = vtanh.f32 %v4333_v61  ;;  %v1733_v2 = vld [vmem:[%s4377_s21] sm:$0xff] }
 0x49d   : > { %3185 = vrcp.f32 %v1700_v1  ;;  %v1736_v1 = vld [vmem:[%s4377_s21 + $0x18] sm:$0xff] }
 0x49e   : > { %v4336_v4 = vadd.f32 %v1708_v56, %v1706_v3 }
 0x4a0   : > { %3187 = vtanh.f32 %v4336_v4 }
 0x4a6   : > { %v3182_v58 = vpop.eup %3181 }
 0x4a9   : > { %v3184_v5 = vpop.eup %3183 }
 0x4aa   : > { %v3186_v62 = vpop.eup %3185  ;;  %v1713_v22 = vmul.f32 %v3184_v5, %v3182_v58  ;;  %v1735_v58 = vld [vmem:[%s4377_s21 + $0x10] sm:$0xff]  ;;  %v1740_v5 = vld [vmem:[%s4377_s21 + $0x38] sm:$0xff] }
 0x4ad   : > { %v3188_v13 = vpop.eup %3187 }
 0x4ae   : > { %v1714_v63 = vmul.f32 %v3188_v13, %v3186_v62 }
 0x4b0   : > { %v1715_v31 = vpack.c.bf16 %v1714_v63, %v1713_v22 }
 0x4b2   : > { %2887 = vst [vmem:[%s1725_s1] sm:$0xff] %v1715_v31   ;;  %1774 = vmatmul.mubr.bf16.vlgmr.msra.gmra.mxu0 %v1715_v31  ;;  %1817 = vmatmul.mubr.bf16.vlgmr.msra.gmra.mxu1 %v1715_v31 }
 0x4b3   : > { %1910 = vmatpush1.bf16.msra.mxu0 %v4140_v6  ;;  %1953 = vmatpush1.bf16.msra.mxu1 %v4144_v8 }
 0x4b4   : > { %1911 = vmatprep.subr.bf16.mxu0 %v4148_v9  ;;  %1954 = vmatprep.subr.bf16.mxu1 %v4152_v10 }
 0x4b5   : > { %1941 = vmatprep.mubr.bf16.mxu0 %v3557_v0  ;;  %1984 = vmatprep.mubr.bf16.mxu1 %v3557_v0 }
 0x4b7   : > { %1912 = vmatpush1.bf16.msra.mxu0 %v4158_v12  ;;  %1955 = vmatpush1.bf16.msra.mxu1 %v4162_v14 }
 0x4b8   : > { %1913 = vmatprep.subr.bf16.mxu0 %v4166_v15  ;;  %1956 = vmatprep.subr.bf16.mxu1 %v4170_v16 }
 0x4bb   : > { %1914 = vmatpush1.bf16.msra.mxu0 %v4174_v17  ;;  %1957 = vmatpush1.bf16.msra.mxu1 %v4178_v11 }
 0x4bc   : > { %1915 = vmatprep.subr.bf16.mxu0 %v4182_v18  ;;  %1958 = vmatprep.subr.bf16.mxu1 %v4186_v19 }
 0x4bf   : > { %1916 = vmatpush1.bf16.msra.mxu0 %v4190_v20  ;;  %1959 = vmatpush1.bf16.msra.mxu1 %v4194_v21 }
 0x4c0   : > { %1917 = vmatprep.subr.bf16.mxu0 %v4198_v23  ;;  %1960 = vmatprep.subr.bf16.mxu1 %v4202_v24 }
 0x4c3   : > { %1918 = vmatpush1.bf16.msra.mxu0 %v4206_v25  ;;  %1961 = vmatpush1.bf16.msra.mxu1 %v4210_v26 }
 0x4c4   : > { %1919 = vmatprep.subr.bf16.mxu0 %v4214_v27  ;;  %1962 = vmatprep.subr.bf16.mxu1 %v4218_v28 }
 0x4c7   : > { %1920 = vmatpush1.bf16.msra.mxu0 %v4222_v29  ;;  %1963 = vmatpush1.bf16.msra.mxu1 %v4226_v30 }
 0x4c8   : > { %1921 = vmatprep.subr.bf16.mxu0 %v4230_v32  ;;  %1964 = vmatprep.subr.bf16.mxu1 %v4234_v33 }
 0x4cb   : > { %1922 = vmatpush1.bf16.msra.mxu0 %v4238_v34  ;;  %1965 = vmatpush1.bf16.msra.mxu1 %v4242_v35 }
 0x4cc   : > { %1923 = vmatprep.subr.bf16.mxu0 %v4246_v36  ;;  %1966 = vmatprep.subr.bf16.mxu1 %v4250_v37 }
 0x4cf   : > { %1924 = vmatpush1.bf16.msra.mxu0 %v4254_v38  ;;  %1967 = vmatpush1.bf16.msra.mxu1 %v4258_v40 }
 0x4d0   : > { %2077 = vmatprep.subr.bf16.mxu0 %v4110_v7  ;;  %2120 = vmatprep.subr.bf16.mxu1 %v4263_v41 }
 0x572   : > { %v1775_v42 = vpop.f32.mrf.mxu0  ;;  %v1818_v53 = vpop.f32.mrf.mxu1 }
 0x573   : > { %v1827_v45 = vadd.f32 %v1775_v42, %v1733_v2  ;;  %v1829_v62 = vadd.f32 %v1818_v53, %v1735_v58 }
 0x574   : > { %v1777_v43 = vpop.f32.mrf.mxu0  ;;  %v1820_v49 = vpop.f32.mrf.mxu1 }
 0x575   : > { %v2782_v39 = vmul.f32 -1.442695, %v1827_v45  ;;  %v1828_v54 = vadd.f32 %v1777_v43, %v1734_v46  ;;  %v1830_v3 = vadd.f32 %v1820_v49, %v1736_v1  ;;  %v1739_v46 = vld [vmem:[%s4377_s21 + $0x30] sm:$0xff]  ;;  %s4527_s21 = scalar_lea.hbm %s4579_s4, %s2830_s14 }
 0x576   : > { %v1779_v47 = vpop.f32.mrf.mxu0  ;;  %v1822_v52 = vpop.f32.mrf.mxu1 }
 0x577   : > { %3189 = vpow2.f32 %v2782_v39  ;;  %v2783_v48 = vmul.f32 -1.442695, %v1828_v54  ;;  %v1831_v50 = vadd.f32 %v1779_v47, %v1737_v44  ;;  %v2786_v63 = vmul.f32 -1.442695, %v1830_v3 }
 0x578   : > { %v1781_v55 = vpop.f32.mrf.mxu0  ;;  %v1824_v56 = vpop.f32.mrf.mxu1  ;;  %v1833_v39 = vadd.f32 %v1822_v52, %v1739_v46 }
 0x579   : > { %3191 = vpow2.f32 %v2783_v48  ;;  %v2784_v57 = vmul.f32 -1.442695, %v1831_v50  ;;  %v1832_v60 = vadd.f32 %v1781_v55, %v1738_v51  ;;  %v1834_v13 = vadd.f32 %v1824_v56, %v1740_v5 }
 0x57b   : > { %3193 = vpow2.f32 %v2784_v57  ;;  %v2785_v59 = vmul.f32 -1.442695, %v1832_v60  ;;  %v2787_v42 = vmul.f32 -1.442695, %v1834_v13 }
 0x57d   : > { %3195 = vpow2.f32 %v2785_v59 }
 0x57e   : > { %3197 = vtanh.f32 %v1829_v62 }
 0x584   : > { %v3190_v22 = vpop.eup %3189 }
 0x585   : > { %v1847_v31 = vadd.f32 1.0, %v3190_v22 }
 0x586   : > { %v3192_v2 = vpop.eup %3191 }
 0x587   : > { %3199 = vrcp.f32 %v1847_v31  ;;  %v1848_v45 = vadd.f32 1.0, %v3192_v2 }
 0x588   : > { %v3194_v43 = vpop.eup %3193  ;;  %3201 = vpow2.f32 %v2786_v63 }
 0x589   : > { %3203 = vrcp.f32 %v1848_v45  ;;  %v1849_v54 = vadd.f32 1.0, %v3194_v43 }
 0x58a   : > { %v3196_v44 = vpop.eup %3195  ;;  %3205 = vpow2.f32 %v2787_v42 }
 0x58b   : > { %3207 = vrcp.f32 %v1849_v54  ;;  %v1850_v47 = vadd.f32 1.0, %v3196_v44  ;;  %v3198_v53 = vpop.eup %3197 }
 0x58c   : > { %3209 = vtanh.f32 %v1833_v39  ;;  %v1902_v39 = vld [vmem:[%s4432_s30 + $0x8] sm:$0xff] }
 0x58d   : > { %3211 = vrcp.f32 %v1850_v47 }
 0x594   : > { %v3200_v48 = vpop.eup %3199 }
 0x595   : > { %v3202_v49 = vpop.eup %3201  ;;  %v1875_v55 = vmul.f32 %v3200_v48, %v3198_v53  ;;  %v1905_v53 = vld [vmem:[%s4432_s30 + $0x20] sm:$0xff] }
 0x596   : > { %v3204_v50 = vpop.eup %3203  ;;  %v1867_v59 = vadd.f32 1.0, %v3202_v49 }
 0x597   : > { %v3206_v51 = vpop.eup %3205  ;;  %v1873_v57 = vmul.f32 %v3204_v50, %v4333_v61  ;;  %v1906_v50 = vld [vmem:[%s4432_s30 + $0x28] sm:$0xff] }
 0x598   : > { %v3208_v60 = vpop.eup %3207  ;;  %v1868_v3 = vadd.f32 1.0, %v3206_v51  ;;  %3213 = vrcp.f32 %v1867_v59 }
 0x599   : > { %v3210_v52 = vpop.eup %3209  ;;  %v4388_v1 = vadd.f32 %v1875_v55, %v1873_v57 }
 0x59a   : > { %v3212_v56 = vpop.eup %3211  ;;  %v1876_v58 = vmul.f32 %v3210_v52, %v3208_v60  ;;  %v1904_v52 = vld [vmem:[%s4432_s30 + $0x18] sm:$0xff] }
 0x59b   : > { %v1874_v5 = vmul.f32 %v3212_v56, %v4336_v4  ;;  %3215 = vtanh.f32 %v4388_v1  ;;  %v1901_v4 = vld [vmem:[%s4432_s30] sm:$0xff] }
 0x59c   : > { %3217 = vrcp.f32 %v1868_v3 }
 0x59d   : > { %v4391_v62 = vadd.f32 %v1876_v58, %v1874_v5  ;;  %v1903_v58 = vld [vmem:[%s4432_s30 + $0x10] sm:$0xff]  ;;  %v1908_v5 = vld [vmem:[%s4432_s30 + $0x38] sm:$0xff] }
 0x59f   : > { %3219 = vtanh.f32 %v4391_v62 }
 0x5a5   : > { %v3214_v61 = vpop.eup %3213 }
 0x5a8   : > { %v3216_v13 = vpop.eup %3215 }
 0x5a9   : > { %v3218_v22 = vpop.eup %3217  ;;  %v1881_v31 = vmul.f32 %v3216_v13, %v3214_v61 }
 0x5ac   : > { %v3220_v63 = vpop.eup %3219 }
 0x5ad   : > { %v1882_v2 = vmul.f32 %v3220_v63, %v3218_v22 }
 0x5af   : > { %v1883_v42 = vpack.c.bf16 %v1882_v2, %v1881_v31 }
 0x5b1   : > { %2892 = vst [vmem:[%s1893_s5] sm:$0xff] %v1883_v42   ;;  %1942 = vmatmul.mubr.bf16.vlgmr.msra.gmra.mxu0 %v1883_v42  ;;  %1985 = vmatmul.mubr.bf16.vlgmr.msra.gmra.mxu1 %v1883_v42  ;;  %s3465_s5 = scalar_lea.vmem %s3464_s23, 2048 }
 0x5b2   : > { %2078 = vmatpush1.bf16.msra.mxu0 %v4140_v6  ;;  %2121 = vmatpush1.bf16.msra.mxu1 %v4144_v8  ;;  %p3467_p1 = scmp.lt.s32.totalorder %s3465_s5, %s3459_s27 }
 0x5b3   : > { %2079 = vmatprep.subr.bf16.mxu0 %v4148_v9  ;;  %2122 = vmatprep.subr.bf16.mxu1 %v4152_v10 }
 0x5b4   : > { %2109 = vmatprep.mubr.bf16.mxu0 %v3557_v0  ;;  %2152 = vmatprep.mubr.bf16.mxu1 %v3557_v0  ;;  %p3468_p6 = por %p3467_p1, %p3466_p4 }
 0x5b6   : > { %2080 = vmatpush1.bf16.msra.mxu0 %v4158_v12  ;;  %2123 = vmatpush1.bf16.msra.mxu1 %v4162_v14  ;;  %p3469_p2 = pnand %p3468_p6, %p3462_p10 }
 0x5b7   : > { %2081 = vmatprep.subr.bf16.mxu0 %v4166_v15  ;;  %2124 = vmatprep.subr.bf16.mxu1 %v4170_v16 }
 0x5ba   : > { %2082 = vmatpush1.bf16.msra.mxu0 %v4174_v17  ;;  %2125 = vmatpush1.bf16.msra.mxu1 %v4178_v11 }
 0x5bb   : > { %2083 = vmatprep.subr.bf16.mxu0 %v4182_v18  ;;  %2126 = vmatprep.subr.bf16.mxu1 %v4186_v19 }
 0x5be   : > { %2084 = vmatpush1.bf16.msra.mxu0 %v4190_v20  ;;  %2127 = vmatpush1.bf16.msra.mxu1 %v4194_v21 }
 0x5bf   : > { %2085 = vmatprep.subr.bf16.mxu0 %v4198_v23  ;;  %2128 = vmatprep.subr.bf16.mxu1 %v4202_v24 }
 0x5c2   : > { %2086 = vmatpush1.bf16.msra.mxu0 %v4206_v25  ;;  %2129 = vmatpush1.bf16.msra.mxu1 %v4210_v26 }
 0x5c3   : > { %2087 = vmatprep.subr.bf16.mxu0 %v4214_v27  ;;  %2130 = vmatprep.subr.bf16.mxu1 %v4218_v28 }
 0x5c6   : > { %2088 = vmatpush1.bf16.msra.mxu0 %v4222_v29  ;;  %2131 = vmatpush1.bf16.msra.mxu1 %v4226_v30 }
 0x5c7   : > { %2089 = vmatprep.subr.bf16.mxu0 %v4230_v32  ;;  %2132 = vmatprep.subr.bf16.mxu1 %v4234_v33 }
 0x5ca   : > { %2090 = vmatpush1.bf16.msra.mxu0 %v4238_v34  ;;  %2133 = vmatpush1.bf16.msra.mxu1 %v4242_v35 }
 0x5cb   : > { %2091 = vmatprep.subr.bf16.mxu0 %v4246_v36  ;;  %2134 = vmatprep.subr.bf16.mxu1 %v4250_v37 }
 0x5ce   : > { %2092 = vmatpush1.bf16.msra.mxu0 %v4254_v38  ;;  %2135 = vmatpush1.bf16.msra.mxu1 %v4258_v40 }
 0x5cf   : > { %2245 = vmatprep.subr.bf16.mxu0 %v4110_v7  ;;  %2288 = vmatprep.subr.bf16.mxu1 %v4263_v41 }
 0x671   : > { %v1943_v45 = vpop.f32.mrf.mxu0  ;;  %v1986_v43 = vpop.f32.mrf.mxu1 }
 0x672   : > { %v1995_v46 = vadd.f32 %v1943_v45, %v1901_v4  ;;  %v1997_v61 = vadd.f32 %v1986_v43, %v1903_v58  ;;  %v1907_v45 = vld [vmem:[%s4432_s30 + $0x30] sm:$0xff] }
 0x673   : > { %v1945_v54 = vpop.f32.mrf.mxu0  ;;  %v1988_v48 = vpop.f32.mrf.mxu1 }
 0x674   : > { %v2794_v44 = vmul.f32 -1.442695, %v1995_v46  ;;  %v1996_v47 = vadd.f32 %v1945_v54, %v1902_v39  ;;  %v1998_v3 = vadd.f32 %v1988_v48, %v1904_v52 }
 0x675   : > { %v1947_v7 = vpop.f32.mrf.mxu0  ;;  %v1990_v60 = vpop.f32.mrf.mxu1 }
 0x676   : > { %3221 = vpow2.f32 %v2794_v44  ;;  %v2795_v41 = vmul.f32 -1.442695, %v1996_v47  ;;  %v1999_v49 = vadd.f32 %v1947_v7, %v1905_v53  ;;  %v2798_v63 = vmul.f32 -1.442695, %v1998_v3 }
 0x677   : > { %v1949_v51 = vpop.f32.mrf.mxu0  ;;  %v1992_v56 = vpop.f32.mrf.mxu1  ;;  %v2001_v39 = vadd.f32 %v1990_v60, %v1907_v45 }
 0x678   : > { %3223 = vpow2.f32 %v2795_v41  ;;  %v2796_v55 = vmul.f32 -1.442695, %v1999_v49  ;;  %v2000_v57 = vadd.f32 %v1949_v51, %v1906_v50  ;;  %v2002_v13 = vadd.f32 %v1992_v56, %v1908_v5 }
 0x67a   : > { %3225 = vpow2.f32 %v2796_v55  ;;  %v2797_v59 = vmul.f32 -1.442695, %v2000_v57  ;;  %v2799_v42 = vmul.f32 -1.442695, %v2002_v13 }
 0x67c   : > { %3227 = vpow2.f32 %v2797_v59 }
 0x67d   : > { %3229 = vtanh.f32 %v1997_v61 }
 0x683   : > { %v3222_v22 = vpop.eup %3221 }
 0x684   : > { %v2015_v31 = vadd.f32 1.0, %v3222_v22 }
 0x685   : > { %v3224_v2 = vpop.eup %3223 }
 0x686   : > { %3231 = vrcp.f32 %v2015_v31  ;;  %v2016_v4 = vadd.f32 1.0, %v3224_v2  ;;  %v2075_v2 = vld [vmem:[%s4485_s8 + $0x30] sm:$0xff] }
 0x687   : > { %v3226_v46 = vpop.eup %3225  ;;  %3233 = vpow2.f32 %v2798_v63 }
 0x688   : > { %3235 = vrcp.f32 %v2016_v4  ;;  %v2017_v54 = vadd.f32 1.0, %v3226_v46 }
 0x689   : > { %v3228_v44 = vpop.eup %3227  ;;  %3237 = vpow2.f32 %v2799_v42 }
 0x68a   : > { %3239 = vrcp.f32 %v2017_v54  ;;  %v2018_v47 = vadd.f32 1.0, %v3228_v44  ;;  %v3230_v43 = vpop.eup %3229 }
 0x68b   : > { %3241 = vtanh.f32 %v2001_v39 }
 0x68c   : > { %3243 = vrcp.f32 %v2018_v47 }
 0x693   : > { %v3232_v53 = vpop.eup %3231 }
 0x694   : > { %v3234_v7 = vpop.eup %3233  ;;  %v2043_v49 = vmul.f32 %v3232_v53, %v3230_v43 }
 0x695   : > { %v3236_v41 = vpop.eup %3235  ;;  %v2035_v55 = vadd.f32 1.0, %v3234_v7 }
 0x696   : > { %v3238_v48 = vpop.eup %3237  ;;  %v2041_v50 = vmul.f32 %v3236_v41, %v4388_v1 }
 0x697   : > { %v3240_v51 = vpop.eup %3239  ;;  %v2036_v52 = vadd.f32 1.0, %v3238_v48  ;;  %3245 = vrcp.f32 %v2035_v55 }
 0x698   : > { %v3242_v57 = vpop.eup %3241  ;;  %v4443_v60 = vadd.f32 %v2043_v49, %v2041_v50 }
 0x699   : > { %v3244_v59 = vpop.eup %3243  ;;  %v2044_v56 = vmul.f32 %v3242_v57, %v3240_v51 }
 0x69a   : > { %v2042_v3 = vmul.f32 %v3244_v59, %v4391_v62  ;;  %3247 = vtanh.f32 %v4443_v60 }
 0x69b   : > { %3249 = vrcp.f32 %v2036_v52 }
 0x69c   : > { %v4446_v58 = vadd.f32 %v2044_v56, %v2042_v3 }
 0x69e   : > { %3251 = vtanh.f32 %v4446_v58 }
 0x6a4   : > { %v3246_v1 = vpop.eup %3245 }
 0x6a7   : > { %v3248_v5 = vpop.eup %3247 }
 0x6a8   : > { %v3250_v61 = vpop.eup %3249  ;;  %v2049_v22 = vmul.f32 %v3248_v5, %v3246_v1 }
 0x6ab   : > { %v3252_v13 = vpop.eup %3251 }
 0x6ac   : > { %v2050_v63 = vmul.f32 %v3252_v13, %v3250_v61 }
 0x6ae   : > { %v2051_v31 = vpack.c.bf16 %v2050_v63, %v2049_v22 }
 0x6b0   : > { %2897 = vst [vmem:[%s2061_s20] sm:$0xff] %v2051_v31   ;;  %2110 = vmatmul.mubr.bf16.vlgmr.msra.gmra.mxu0 %v2051_v31  ;;  %2153 = vmatmul.mubr.bf16.vlgmr.msra.gmra.mxu1 %v2051_v31 }
 0x6b1   : > { %2246 = vmatpush1.bf16.msra.mxu0 %v4140_v6  ;;  %2289 = vmatpush1.bf16.msra.mxu1 %v4144_v8 }
 0x6b2   : > { %2247 = vmatprep.subr.bf16.mxu0 %v4148_v9  ;;  %2290 = vmatprep.subr.bf16.mxu1 %v4152_v10  ;;  %v2070_v10 = vld [vmem:[%s4485_s8 + $0x8] sm:$0xff] }
 0x6b3   : > { %2277 = vmatprep.mubr.bf16.mxu0 %v3557_v0  ;;  %2320 = vmatprep.mubr.bf16.mxu1 %v3557_v0  ;;  %v2069_v0 = vld [vmem:[%s4485_s8] sm:$0xff] }
 0x6b5   : > { %2248 = vmatpush1.bf16.msra.mxu0 %v4158_v12  ;;  %2291 = vmatpush1.bf16.msra.mxu1 %v4162_v14 }
 0x6b6   : > { %2249 = vmatprep.subr.bf16.mxu0 %v4166_v15  ;;  %2292 = vmatprep.subr.bf16.mxu1 %v4170_v16  ;;  %v2073_v16 = vld [vmem:[%s4485_s8 + $0x20] sm:$0xff] }
 0x6b9   : > { %2250 = vmatpush1.bf16.msra.mxu0 %v4174_v17  ;;  %2293 = vmatpush1.bf16.msra.mxu1 %v4178_v11 }
 0x6ba   : > { %2251 = vmatprep.subr.bf16.mxu0 %v4182_v18  ;;  %2294 = vmatprep.subr.bf16.mxu1 %v4186_v19 }
 0x6bd   : > { %2252 = vmatpush1.bf16.msra.mxu0 %v4190_v20  ;;  %2295 = vmatpush1.bf16.msra.mxu1 %v4194_v21  ;;  %v2074_v20 = vld [vmem:[%s4485_s8 + $0x28] sm:$0xff] }
 0x6be   : > { %2253 = vmatprep.subr.bf16.mxu0 %v4198_v23  ;;  %2296 = vmatprep.subr.bf16.mxu1 %v4202_v24 }
 0x6c1   : > { %2254 = vmatpush1.bf16.msra.mxu0 %v4206_v25  ;;  %2297 = vmatpush1.bf16.msra.mxu1 %v4210_v26 }
 0x6c2   : > { %2255 = vmatprep.subr.bf16.mxu0 %v4214_v27  ;;  %2298 = vmatprep.subr.bf16.mxu1 %v4218_v28  ;;  %v2072_v27 = vld [vmem:[%s4485_s8 + $0x18] sm:$0xff] }
 0x6c5   : > { %2256 = vmatpush1.bf16.msra.mxu0 %v4222_v29  ;;  %2299 = vmatpush1.bf16.msra.mxu1 %v4226_v30  ;;  %v2071_v30 = vld [vmem:[%s4485_s8 + $0x10] sm:$0xff] }
 0x6c6   : > { %2257 = vmatprep.subr.bf16.mxu0 %v4230_v32  ;;  %2300 = vmatprep.subr.bf16.mxu1 %v4234_v33  ;;  %v2076_v32 = vld [vmem:[%s4485_s8 + $0x38] sm:$0xff] }
 0x6c9   : > { %2258 = vmatpush1.bf16.msra.mxu0 %v4238_v34  ;;  %2301 = vmatpush1.bf16.msra.mxu1 %v4242_v35 }
 0x6ca   : > { %2259 = vmatprep.subr.bf16.mxu0 %v4246_v36  ;;  %2302 = vmatprep.subr.bf16.mxu1 %v4250_v37 }
 0x6cd   : > { %2260 = vmatpush1.bf16.msra.mxu0 %v4254_v38  ;;  %2303 = vmatpush1.bf16.msra.mxu1 %v4258_v40 }
 0x770   : > { %v2111_v6 = vpop.f32.mrf.mxu0  ;;  %v2154_v9 = vpop.f32.mrf.mxu1 }
 0x771   : > { %v2163_v8 = vadd.f32 %v2111_v6, %v2069_v0  ;;  %v2165_v33 = vadd.f32 %v2154_v9, %v2071_v30  ;;  %v2238_v6 = vld [vmem:[%s4506_s6 + $0x8] sm:$0xff] }
 0x772   : > { %v2113_v12 = vpop.f32.mrf.mxu0  ;;  %v2156_v18 = vpop.f32.mrf.mxu1 }
 0x773   : > { %v2806_v14 = vmul.f32 -1.442695, %v2163_v8  ;;  %v2164_v15 = vadd.f32 %v2113_v12, %v2070_v10  ;;  %v2166_v29 = vadd.f32 %v2156_v18, %v2072_v27  ;;  %v2241_v12 = vld [vmem:[%s4506_s6 + $0x20] sm:$0xff]  ;;  %v2239_v27 = vld [vmem:[%s4506_s6 + $0x10] sm:$0xff] }
 0x774   : > { %v2115_v17 = vpop.f32.mrf.mxu0  ;;  %v2158_v25 = vpop.f32.mrf.mxu1 }
 0x775   : > { %3253 = vpow2.f32 %v2806_v14  ;;  %v2807_v11 = vmul.f32 -1.442695, %v2164_v15  ;;  %v2167_v19 = vadd.f32 %v2115_v17, %v2073_v16  ;;  %v2810_v36 = vmul.f32 -1.442695, %v2166_v29 }
 0x776   : > { %v2117_v21 = vpop.f32.mrf.mxu0  ;;  %v2160_v28 = vpop.f32.mrf.mxu1  ;;  %v2169_v4 = vadd.f32 %v2158_v25, %v2075_v2 }
 0x777   : > { %3255 = vpow2.f32 %v2807_v11  ;;  %v2808_v23 = vmul.f32 -1.442695, %v2167_v19  ;;  %v2168_v24 = vadd.f32 %v2117_v21, %v2074_v20  ;;  %v2170_v34 = vadd.f32 %v2160_v28, %v2076_v32  ;;  %v2242_v11 = vld [vmem:[%s4506_s6 + $0x28] sm:$0xff]  ;;  %v2244_v28 = vld [vmem:[%s4506_s6 + $0x38] sm:$0xff] }
 0x779   : > { %3257 = vpow2.f32 %v2808_v23  ;;  %v2809_v26 = vmul.f32 -1.442695, %v2168_v24  ;;  %v2811_v40 = vmul.f32 -1.442695, %v2170_v34  ;;  %v2240_v24 = vld [vmem:[%s4506_s6 + $0x18] sm:$0xff] }
 0x77b   : > { %3259 = vpow2.f32 %v2809_v26 }
 0x77c   : > { %3261 = vtanh.f32 %v2165_v33 }
 0x782   : > { %v3254_v35 = vpop.eup %3253 }
 0x783   : > { %v2183_v37 = vadd.f32 1.0, %v3254_v35 }
 0x784   : > { %v3256_v38 = vpop.eup %3255 }
 0x785   : > { %3263 = vrcp.f32 %v2183_v37  ;;  %v2184_v62 = vadd.f32 1.0, %v3256_v38  ;;  %v2243_v38 = vld [vmem:[%s4506_s6 + $0x30] sm:$0xff] }
 0x786   : > { %v3258_v42 = vpop.eup %3257  ;;  %3265 = vpow2.f32 %v2810_v36 }
 0x787   : > { %3267 = vrcp.f32 %v2184_v62  ;;  %v2185_v45 = vadd.f32 1.0, %v3258_v42 }
 0x788   : > { %v3260_v46 = vpop.eup %3259  ;;  %3269 = vpow2.f32 %v2811_v40 }
 0x789   : > { %3271 = vrcp.f32 %v2185_v45  ;;  %v2186_v39 = vadd.f32 1.0, %v3260_v46  ;;  %v3262_v54 = vpop.eup %3261 }
 0x78a   : > { %3273 = vtanh.f32 %v2169_v4 }
 0x78b   : > { %3275 = vrcp.f32 %v2186_v39 }
 0x792   : > { %v3264_v44 = vpop.eup %3263 }
 0x793   : > { %v3266_v47 = vpop.eup %3265  ;;  %v2211_v7 = vmul.f32 %v3264_v44, %v3262_v54 }
 0x794   : > { %v3268_v43 = vpop.eup %3267  ;;  %v2203_v49 = vadd.f32 1.0, %v3266_v47 }
 0x795   : > { %v3270_v53 = vpop.eup %3269  ;;  %v2209_v41 = vmul.f32 %v3268_v43, %v4443_v60 }
 0x796   : > { %v3272_v48 = vpop.eup %3271  ;;  %v2204_v57 = vadd.f32 1.0, %v3270_v53  ;;  %3277 = vrcp.f32 %v2203_v49 }
 0x797   : > { %v3274_v50 = vpop.eup %3273  ;;  %v4496_v51 = vadd.f32 %v2211_v7, %v2209_v41 }
 0x798   : > { %v3276_v55 = vpop.eup %3275  ;;  %v2212_v59 = vmul.f32 %v3274_v50, %v3272_v48 }
 0x799   : > { %v2210_v52 = vmul.f32 %v3276_v55, %v4446_v58  ;;  %3279 = vtanh.f32 %v4496_v51  ;;  %v2237_v58 = vld [vmem:[%s4506_s6] sm:$0xff] }
 0x79a   : > { %3281 = vrcp.f32 %v2204_v57 }
 0x79b   : > { %v4499_v56 = vadd.f32 %v2212_v59, %v2210_v52 }
 0x79d   : > { %3283 = vtanh.f32 %v4499_v56 }
 0x7a3   : > { %v3278_v60 = vpop.eup %3277 }
 0x7a6   : > { %v3280_v3 = vpop.eup %3279 }
 0x7a7   : > { %v3282_v1 = vpop.eup %3281  ;;  %v2217_v61 = vmul.f32 %v3280_v3, %v3278_v60 }
 0x7aa   : > { %v3284_v5 = vpop.eup %3283 }
 0x7ab   : > { %v2218_v13 = vmul.f32 %v3284_v5, %v3282_v1 }
 0x7ad   : > { %v2219_v22 = vpack.c.bf16 %v2218_v13, %v2217_v61 }
 0x7af   : > { %2902 = vst [vmem:[%s2229_s29] sm:$0xff] %v2219_v22   ;;  %2278 = vmatmul.mubr.bf16.vlgmr.msra.gmra.mxu0 %v2219_v22  ;;  %2321 = vmatmul.mubr.bf16.vlgmr.msra.gmra.mxu1 %v2219_v22 }
 0x86f   : > { %v2279_v63 = vpop.f32.mrf.mxu0  ;;  %v2322_v0 = vpop.f32.mrf.mxu1 }
 0x870   : > { %v2331_v31 = vadd.f32 %v2279_v63, %v2237_v58  ;;  %v2333_v29 = vadd.f32 %v2322_v0, %v2239_v27 }
 0x871   : > { %v2281_v8 = vpop.f32.mrf.mxu0  ;;  %v2324_v16 = vpop.f32.mrf.mxu1 }
 0x872   : > { %v2818_v9 = vmul.f32 -1.442695, %v2331_v31  ;;  %v2332_v10 = vadd.f32 %v2281_v8, %v2238_v6  ;;  %v2334_v26 = vadd.f32 %v2324_v16, %v2240_v24 }
 0x873   : > { %v2283_v14 = vpop.f32.mrf.mxu0  ;;  %v2326_v21 = vpop.f32.mrf.mxu1 }
 0x874   : > { %3285 = vpow2.f32 %v2818_v9  ;;  %v2819_v15 = vmul.f32 -1.442695, %v2332_v10  ;;  %v2335_v17 = vadd.f32 %v2283_v14, %v2241_v12  ;;  %v2822_v33 = vmul.f32 -1.442695, %v2334_v26 }
 0x875   : > { %v2285_v18 = vpop.f32.mrf.mxu0  ;;  %v2328_v25 = vpop.f32.mrf.mxu1  ;;  %v2337_v62 = vadd.f32 %v2326_v21, %v2243_v38 }
 0x876   : > { %3287 = vpow2.f32 %v2819_v15  ;;  %v2820_v19 = vmul.f32 -1.442695, %v2335_v17  ;;  %v2336_v20 = vadd.f32 %v2285_v18, %v2242_v11  ;;  %v2338_v30 = vadd.f32 %v2328_v25, %v2244_v28 }
 0x878   : > { %3289 = vpow2.f32 %v2820_v19  ;;  %v2821_v23 = vmul.f32 -1.442695, %v2336_v20  ;;  %v2823_v36 = vmul.f32 -1.442695, %v2338_v30 }
 0x87a   : > { %3291 = vpow2.f32 %v2821_v23 }
 0x87b   : > { %3293 = vtanh.f32 %v2333_v29 }
 0x881   : > { %v3286_v32 = vpop.eup %3285 }
 0x882   : > { %v2351_v34 = vadd.f32 1.0, %v3286_v32 }
 0x883   : > { %v3288_v35 = vpop.eup %3287 }
 0x884   : > { %3295 = vrcp.f32 %v2351_v34  ;;  %v2352_v37 = vadd.f32 1.0, %v3288_v35 }
 0x885   : > { %v3290_v40 = vpop.eup %3289  ;;  %3297 = vpow2.f32 %v2822_v33 }
 0x886   : > { %3299 = vrcp.f32 %v2352_v37  ;;  %v2353_v2 = vadd.f32 1.0, %v3290_v40 }
 0x887   : > { %v3292_v42 = vpop.eup %3291  ;;  %3301 = vpow2.f32 %v2823_v36 }
 0x888   : > { %3303 = vrcp.f32 %v2353_v2  ;;  %v2354_v4 = vadd.f32 1.0, %v3292_v42  ;;  %v3294_v45 = vpop.eup %3293 }
 0x889   : > { %3305 = vtanh.f32 %v2337_v62 }
 0x88a   : > { %3307 = vrcp.f32 %v2354_v4 }
 0x891   : > { %v3296_v46 = vpop.eup %3295 }
 0x892   : > { %v3298_v39 = vpop.eup %3297  ;;  %v2379_v47 = vmul.f32 %v3296_v46, %v3294_v45 }
 0x893   : > { %v3300_v54 = vpop.eup %3299  ;;  %v2371_v7 = vadd.f32 1.0, %v3298_v39 }
 0x894   : > { %v3302_v44 = vpop.eup %3301  ;;  %v2377_v43 = vmul.f32 %v3300_v54, %v4496_v51 }
 0x895   : > { %v3304_v53 = vpop.eup %3303  ;;  %v2372_v50 = vadd.f32 1.0, %v3302_v44  ;;  %3309 = vrcp.f32 %v2371_v7 }
 0x896   : > { %v3306_v41 = vpop.eup %3305  ;;  %v2381_v48 = vadd.f32 %v2379_v47, %v2377_v43 }
 0x897   : > { %v3308_v49 = vpop.eup %3307  ;;  %v2380_v55 = vmul.f32 %v3306_v41, %v3304_v53 }
 0x898   : > { %v2378_v57 = vmul.f32 %v3308_v49, %v4499_v56  ;;  %3311 = vtanh.f32 %v2381_v48 }
 0x899   : > { %3313 = vrcp.f32 %v2372_v50 }
 0x89a   : > { %v2382_v59 = vadd.f32 %v2380_v55, %v2378_v57 }
 0x89c   : > { %3315 = vtanh.f32 %v2382_v59 }
 0x8a2   : > { %v3310_v52 = vpop.eup %3309 }
 0x8a5   : > { %v3312_v51 = vpop.eup %3311 }
 0x8a6   : > { %v3314_v60 = vpop.eup %3313  ;;  %v2385_v56 = vmul.f32 %v3312_v51, %v3310_v52 }
 0x8a9   : > { %v3316_v3 = vpop.eup %3315 }
 0x8aa   : > { %v2386_v1 = vmul.f32 %v3316_v3, %v3314_v60 }
 0x8ac   : > { %v2906_v5 = vpack.c.bf16 %v2386_v1, %v2385_v56 }
 0x8ae   : > { %2907 = vst [vmem:[%s2397_s9] sm:$0xff] %v2906_v5  }
 0x8af   : > { %3472 = shalt.err (!%p3469_p2)
}
 0x8b0   : > { %s3473_s24 = scalar_lea.hbm %s4527_s21, 1024  ;;  %s3477_s20 = scalar_lea.hbm %s4579_s4, 2048 }
 0x8b1   : > { %p3474_p9 = scmp.ne.s32.totalorder %s4527_s21, %s3473_s24  ;;  %p3478_p5 = scmp.lt.s32.totalorder %s4527_s21, %s4579_s4 }
 0x8b2   : > { %p3479_p12 = scmp.lt.s32.totalorder %s3477_s20, %s3473_s24 }
 0x8b3   : > { %p3475_p11 = pnand %p3474_p9, %p4612_p0 }
 0x8b4   : > { %p3480_p13 = por %p3479_p12, %p3478_p5 }
 0x8b5   : > { %p3476_p3 = pneg %p3475_p11 }
 0x8b7   : > { %p3481_p8 = pnand %p3480_p13, %p3476_p3 }
 0x8b9   : > { %3484 = shalt.err (!%p3481_p8)
}
 0x8ba   : > { %s3560_s10 = smov 64   ;;  %s3561_s29 = smov 128  }
 0x8bb   : > { %s3562_s17 = smov 4  }
 0x8bc   : > { %2918 = dma.vmem_to_hbm [thread:$0]  (%p4612_p0), %s4522_s13, 1024, %s4527_s21, %s2405_s7, %s3560_s10, %s3561_s29, %s3562_s17  }
 0x8bd PF: > { %s4613_s6 = sld [smem:[#allocation22_spill]]  ;;  %s2438_s14 = sand.u32 1, %s3527_s15  }
 0x8be   : > { %s4614_s25 = sld [smem:[#allocation19_spill]]  ;;  %s2439_s9 = scalar_lea.sflag [#allocation7], %s2438_s14 }
 0x8c3   : > { %p4615_p7 = scmp.ne.s32.totalorder %s4613_s6, 0 }
 0x8c4   : > { %p4616_p10 = scmp.ge.s32.totalorder %s4614_s25, 2 }
 0x8c6   : > { %p2934_p4 = pnand %p4616_p10, %p4615_p7 }
 0x8c8   : > { %p2935_p1 = pneg %p2934_p4 }
 0x8ca   : > { %3522 = dma.done.wait (%p2935_p1), %s2439_s9, 1024  }
 0x8cb   : > { %3524 = vsyncadd (%p2935_p1), %s2439_s9, 4294966272  ;;  %s26_s20 = sadd.s32 1, %s4614_s25   ;;  %s4617_s1 = sld [smem:[#allocation18_spill]] }
 0x8cc   : > { %p23_p6 = scmp.ge.s32.totalorder %s26_s20, 4   ;;  %s4618_s17 = sld [smem:[#allocation21_spill]] }
 0x8cd   : > { %s4619_s28 = sld [smem:[#allocation20_spill]]  ;;  %s4620_s15 = smov %s3531_s16 }
 0x8ce   : > { %s4622_s18 = smov %s3543_s19 }
 0x8cf   :  { %25 = sbr.rel (!%p23_p6) target bundleno = 12 (0xc), region = 138 }
 0x8d1   : > { %s4621_s16 = smov %s4617_s1 }
 0x8d3   : > { %s4623_s19 = smov %s4619_s28 }
 0x8d4   :  { %2444 = vsyncpa [#allocation6], 1 }
 0x8d5   :  { %2446 = vsyncpa [#allocation6 + $0x1], 1 }
 0x8d6   :  { %2447 = vsyncpa [#allocation9], 1 }
 0x8d7   :  { %2449 = vsyncpa [#allocation9 + $0x1], 1 }
 0x8d8   :  { %2450 = vsyncpa [#allocation12], 1 }
 0x8d9   :  { %2452 = vsyncpa [#allocation12 + $0x1], 1 }
 0x8da   :  { %2453 = vsyncpa [#allocation7], 1 }
 0x8db   :  { %2455 = vsyncpa [#allocation7 + $0x1], 1 }

</bundles_post_ra>
